<compile_context>
chip_gen: v6e
topology: v6e:2x2x1
jax: 0.10.0
libtpu: 0.0.40
codegen_flags: <defaults>
</compile_context>

<pallas_src>
import math
from functools import lru_cache, partial

import numpy as np
import jax
import jax.numpy as jnp
from jax.experimental import pallas as pl
from jax.experimental.pallas import tpu as pltpu

LANE = 128
MAX_BLOCK_ROWS = 4096          # 4096 x 128 x 4B = 2 MiB per f32 stream per buffer
SPLIT_ROWS = 1024              # split single-block tensors so grid >= 2 (v7x 2 TCs)
TINY_N = 16 * 1024             # below this, plain fused jnp beats a pallas dispatch
VMEM_LIMIT_BYTES = 48 * 1024 * 1024


def _cdiv(a, b):
    return -(-a // b)


def _ceil_to(a, m):
    return _cdiv(a, m) * m


def _sublane(*dtype_names):
    """Packed sublane granularity: 8 rows for 4-byte, 16 for 2-byte, 32 for 1-byte."""
    itemsize = min(jnp.dtype(d).itemsize for d in dtype_names)
    return max(8, 32 // max(1, int(itemsize)))


# ---------------------------------------------------------------------------
# In-kernel parameterization of the multiplier (VPU + EUP elementwise).
# ---------------------------------------------------------------------------
def _param(m, parameterization):
    if parameterization == "softplus":
        # numerically stable softplus: max(x,0) + log1p(exp(-|x|))
        return jnp.maximum(m, 0.0) + jnp.log1p(jnp.exp(-jnp.abs(m)))
    if parameterization == "exp":
        return jnp.exp(m)
    return m  # identity (eq / "none")


def _multiplier_kernel(lag_ref, out_ref, *, parameterization):
    m = lag_ref[...].astype(jnp.float32)
    out_ref[...] = _param(m, parameterization).astype(out_ref.dtype)


def _forward_kernel_norhs(lag_ref, lhs_ref, out_ref, *, parameterization, negate):
    m = _param(lag_ref[...].astype(jnp.float32), parameterization)
    out = m * lhs_ref[...].astype(jnp.float32)
    if negate:
        out = -out
    out_ref[...] = out.astype(out_ref.dtype)


def _forward_kernel_rhs(lag_ref, lhs_ref, rhs_ref, out_ref, *, parameterization,
                        negate):
    m = _param(lag_ref[...].astype(jnp.float32), parameterization)
    lhs = lhs_ref[...].astype(jnp.float32)
    rhs = rhs_ref[...].astype(jnp.float32)
    # fold sign into the subtraction instead of multiplying by -1.0
    diff = (rhs - lhs) if negate else (lhs - rhs)
    out_ref[...] = (m * diff).astype(out_ref.dtype)


# ---------------------------------------------------------------------------
# Tiling plan / canonical lane-dense layout helpers.
# ---------------------------------------------------------------------------
def _tile_plan(n, sublane):
    """(padded_rows, block_rows, grid) for a flattened tensor of n elements."""
    rows = _ceil_to(_cdiv(n, LANE), sublane)
    grid = _cdiv(rows, MAX_BLOCK_ROWS)
    if grid == 1 and rows >= SPLIT_ROWS:
        grid = 2                      # let the "parallel" axis use both TCs on v7x
    block_rows = _ceil_to(_cdiv(rows, grid), sublane)
    padded_rows = block_rows * grid   # overshoot is at most grid*sublane-1 rows
    return padded_rows, block_rows, grid


def _canon(x, n, padded_elems, rows):
    """Flatten to a lane-dense (rows, 128) view; pad only if actually needed."""
    flat = jnp.ravel(x)
    if padded_elems > n:
        flat = jnp.pad(flat, (0, padded_elems - n))
    return flat.reshape(rows, LANE)


def _restore(out, n, padded_elems, shape):
    if padded_elems == n:
        return out.reshape(shape)     # free: contiguous reshape, no slice pass
    return out.reshape(-1)[:n].reshape(shape)


def _build_call(kernel, n_in, rows, block_rows, grid, out_dtype):
    spec = pl.BlockSpec((block_rows, LANE), lambda i: (i, 0))
    return pl.pallas_call(
        kernel,
        out_shape=jax.ShapeDtypeStruct((rows, LANE), out_dtype),
        grid=(grid,),
        in_specs=[spec] * n_in,
        out_specs=spec,
        compiler_params=pltpu.CompilerParams(
            dimension_semantics=("parallel",),
            vmem_limit_bytes=VMEM_LIMIT_BYTES,
        ),
    )


# ---------------------------------------------------------------------------
# Cached, jitted builders (one compiled executable per config).
# ---------------------------------------------------------------------------
@lru_cache(maxsize=None)
def _get_multiplier_fn(shape, lag_dtype_name, parameterization):
    out_dtype = jnp.dtype(lag_dtype_name)
    n = int(np.prod(shape)) if shape else 1

    if n < TINY_N:
        def tiny(lag):
            m = _param(lag.astype(jnp.float32), parameterization)
            return m.astype(out_dtype)
        return jax.jit(tiny)

    sublane = _sublane(lag_dtype_name)
    rows, block_rows, grid = _tile_plan(n, sublane)
    padded = rows * LANE
    kernel = partial(_multiplier_kernel, parameterization=parameterization)
    call = _build_call(kernel, 1, rows, block_rows, grid, out_dtype)

    def fn(lag):
        out = call(_canon(lag, n, padded, rows))
        return _restore(out, n, padded, shape)

    return jax.jit(fn)


@lru_cache(maxsize=None)
def _get_forward_fn(shape, dtype_names, parameterization, negate, has_rhs):
    # dtype_names = (lag_dtype, lhs_dtype[, rhs_dtype])
    out_dtype = jnp.result_type(*[jnp.dtype(d) for d in dtype_names])
    n = int(np.prod(shape)) if shape else 1

    if n < TINY_N:
        # Tiny / scalar fast path: XLA fuses these few VPU/EUP ops into one op.
        if has_rhs:
            def tiny(lag, lhs, rhs):
                m = _param(lag.astype(jnp.float32), parameterization)
                l32, r32 = lhs.astype(jnp.float32), rhs.astype(jnp.float32)
                diff = (r32 - l32) if negate else (l32 - r32)
                return (m * diff).astype(out_dtype)
        else:
            def tiny(lag, lhs):
                m = _param(lag.astype(jnp.float32), parameterization)
                out = m * lhs.astype(jnp.float32)
                return (-out if negate else out).astype(out_dtype)
        return jax.jit(tiny)

    sublane = _sublane(*dtype_names)
    rows, block_rows, grid = _tile_plan(n, sublane)
    padded = rows * LANE

    if has_rhs:
        kernel = partial(_forward_kernel_rhs, parameterization=parameterization,
                         negate=negate)
        call = _build_call(kernel, 3, rows, block_rows, grid, out_dtype)

        def fn(lag, lhs, rhs):
            out = call(_canon(lag, n, padded, rows),
                       _canon(lhs, n, padded, rows),
                       _canon(rhs, n, padded, rows))
            return _restore(out, n, padded, shape)
    else:
        kernel = partial(_forward_kernel_norhs, parameterization=parameterization,
                         negate=negate)
        call = _build_call(kernel, 2, rows, block_rows, grid, out_dtype)

        def fn(lag, lhs):
            out = call(_canon(lag, n, padded, rows),
                       _canon(lhs, n, padded, rows))
            return _restore(out, n, padded, shape)

    return jax.jit(fn)


# ---------------------------------------------------------------------------
# Python wrapper mirroring LagrangeMultiplier.forward semantics.
# ---------------------------------------------------------------------------
class LagrangeMultiplierPallas:
    def __init__(self, init_value: float = 1.0, constraint_shape=(),
                 constraint_type: str = "eq", parameterization=None,
                 dtype=jnp.float32):
        self.constraint_type = constraint_type
        self.parameterization = parameterization
        self.constraint_shape = tuple(int(s) for s in constraint_shape)
        self.dtype = jnp.dtype(dtype)

        if constraint_type != "eq":
            assert init_value > 0, (
                "Inequality constraints must have non-negative initial "
                "multiplier values")
            if parameterization == "softplus":
                init_value = math.log(math.exp(init_value) - 1.0)
            elif parameterization == "exp":
                init_value = math.log(init_value)
            elif parameterization == "none":
                pass
            else:
                raise ValueError(
                    f"Invalid multiplier parameterization {parameterization}")
        else:
            assert parameterization is None, (
                "Equality constraints must have no parameterization")

        # deterministic parameter init (synthetic; no checkpoint loading)
        self.lagrange = jnp.full(self.constraint_shape, init_value,
                                 dtype=self.dtype)

    # effective parameterization seen by the kernel (None => identity)
    def _eff_param(self):
        if self.constraint_type == "eq" or self.parameterization in (None, "none"):
            return None
        return self.parameterization

    def __call__(self, lhs=None, rhs=None):
        eff = self._eff_param()
        if lhs is None:
            if eff is None:
                # identity: skip the kernel / HBM round-trip entirely
                return self.lagrange
            fn = _get_multiplier_fn(self.constraint_shape, self.dtype.name, eff)
            return fn(self.lagrange)

        assert tuple(lhs.shape) == self.constraint_shape, (
            f"Shape mismatch: {tuple(lhs.shape)} vs {self.constraint_shape}")
        negate = self.constraint_type == "leq"
        if rhs is None:
            fn = _get_forward_fn(
                self.constraint_shape,
                (self.dtype.name, jnp.dtype(lhs.dtype).name),
                eff, negate, False)
            return fn(self.lagrange, lhs)

        assert tuple(rhs.shape) == self.constraint_shape, (
            f"Shape mismatch: {tuple(rhs.shape)} vs {self.constraint_shape}")
        fn = _get_forward_fn(
            self.constraint_shape,
            (self.dtype.name, jnp.dtype(lhs.dtype).name,
             jnp.dtype(rhs.dtype).name),
            eff, negate, True)
        return fn(self.lagrange, lhs, rhs)


# ---------------------------------------------------------------------------
# Pure-JAX reference for correctness checking (computed in float32).
# ---------------------------------------------------------------------------
def _reference(lagrange, constraint_type, parameterization, lhs=None, rhs=None):
    m = lagrange.astype(jnp.float32)
    if constraint_type != "eq":
        if parameterization == "softplus":
            m = jax.nn.softplus(m)
        elif parameterization == "exp":
            m = jnp.exp(m)
    if lhs is None:
        return m
    lhs = lhs.astype(jnp.float32)
    rhs = jnp.zeros_like(lhs) if rhs is None else rhs.astype(jnp.float32)
    diff = lhs - rhs
    out = m * diff
    return -out if constraint_type == "leq" else out


if __name__ == "__main__":
    key = jax.random.PRNGKey(0)
    k1, k2, k3, k4, k5, k6 = jax.random.split(key, 6)
    ok = True

    # --- case 1: geq + softplus, full forward, kernel path, no pad/slice ----
    # (1088, 128): 1088 rows, grid of 2 x 544-row tiles, zero padding.
    shape1 = (1088, 128)
    lhs1 = jax.random.normal(k1, shape1, dtype=jnp.float32)
    rhs1 = jax.random.normal(k2, shape1, dtype=jnp.float32)
    mod_geq = LagrangeMultiplierPallas(init_value=1.0, constraint_shape=shape1,
                                       constraint_type="geq",
                                       parameterization="softplus")
    out1 = jax.block_until_ready(mod_geq(lhs1, rhs1))
    ref1 = _reference(mod_geq.lagrange, "geq", "softplus", lhs1, rhs1)
    ok &= bool(jnp.allclose(out1, ref1, atol=1e-5, rtol=1e-5))

    # --- case 2: leq + exp, ragged shape, rhs defaulted, kernel + pad path ---
    shape2 = (257, 130)  # 33410 elems: not a multiple of 128 -> exercises padding
    lhs2 = jax.random.normal(k3, shape2, dtype=jnp.float32)
    mod_leq = LagrangeMultiplierPallas(init_value=1.0, constraint_shape=shape2,
                                       constraint_type="leq",
                                       parameterization="exp")
    out2 = jax.block_until_ready(mod_leq(lhs2))
    ref2 = _reference(mod_leq.lagrange, "leq", "exp", lhs2, None)
    ok &= bool(jnp.allclose(out2, ref2, atol=1e-5, rtol=1e-5))

    # --- case 3: equality constraint, no lhs -> raw multiplier (no kernel) --
    mod_eq = LagrangeMultiplierPallas(init_value=1.0, constraint_shape=(8, 128),
                                      constraint_type="eq",
                                      parameterization=None)
    out3 = jax.block_until_ready(mod_eq())
    ref3 = _reference(mod_eq.lagrange, "eq", None)
    ok &= bool(jnp.allclose(out3, ref3, atol=1e-6, rtol=1e-6))

    # --- case 4: scalar constraint (typical serl usage) -> tiny jnp path ----
    mod_scalar = LagrangeMultiplierPallas(init_value=1.0, constraint_shape=(),
                                          constraint_type="geq",
                                          parameterization="softplus")
    out4 = jax.block_until_ready(mod_scalar())
    ref4 = _reference(mod_scalar.lagrange, "geq", "softplus")
    ok &= bool(jnp.allclose(out4, ref4, atol=1e-5, rtol=1e-5))

    # --- case 5: bf16 I/O kernel path (f32 compute inside the kernel) -------
    shape5 = (128, 256)
    lhs5 = jax.random.normal(k4, shape5, dtype=jnp.float32).astype(jnp.bfloat16)
    mod_bf16 = LagrangeMultiplierPallas(init_value=1.0, constraint_shape=shape5,
                                        constraint_type="geq",
                                        parameterization="softplus",
                                        dtype=jnp.bfloat16)
    out5 = jax.block_until_ready(mod_bf16(lhs5))
    ref5 = _reference(mod_bf16.lagrange, "geq", "softplus", lhs5, None)
    ok &= bool(jnp.allclose(out5.astype(jnp.float32), ref5, atol=2e-2, rtol=2e-2))

    # --- case 6: small full forward with lhs+rhs -> tiny fused jnp path -----
    shape6 = (3, 5, 7)
    lhs6 = jax.random.normal(k5, shape6, dtype=jnp.float32)
    rhs6 = jax.random.normal(k6, shape6, dtype=jnp.float32)
    mod_tiny = LagrangeMultiplierPallas(init_value=0.5, constraint_shape=shape6,
                                        constraint_type="leq",
                                        parameterization="softplus")
    out6 = jax.block_until_ready(mod_tiny(lhs6, rhs6))
    ref6 = _reference(mod_tiny.lagrange, "leq", "softplus", lhs6, rhs6)
    ok &= bool(jnp.allclose(out6, ref6, atol=1e-5, rtol=1e-5))

    # --- case 7: eq constraint with lhs (identity multiplier), tiny path ----
    shape7 = (4, 16)
    lhs7 = jax.random.normal(k1, shape7, dtype=jnp.float32)
    mod_eq2 = LagrangeMultiplierPallas(init_value=2.0, constraint_shape=shape7,
                                       constraint_type="eq",
                                       parameterization=None)
    out7 = jax.block_until_ready(mod_eq2(lhs7))
    ref7 = _reference(mod_eq2.lagrange, "eq", None, lhs7, None)
    ok &= bool(jnp.allclose(out7, ref7, atol=1e-6, rtol=1e-6))

    if ok:
        print("KERNEL_OK")
    else:
        raise SystemExit("mismatch vs reference")
</pallas_src>

<mosaic_0001>
module attributes {stable_mosaic.version = 11 : i64} {
  func.func @_forward_kernel_rhs(%arg0: i32, %arg1: memref<544x128xf32, #tpu.memory_space<vmem>>, %arg2: memref<544x128xf32, #tpu.memory_space<vmem>>, %arg3: memref<544x128xf32, #tpu.memory_space<vmem>>, %arg4: memref<544x128xf32, #tpu.memory_space<vmem>>) attributes {dimension_semantics = [#tpu.dimension_semantics<parallel>], iteration_bounds = array<i64: 2>, scalar_prefetch = 0 : i64, scratch_operands = 0 : i64, tpu.core_type = #tpu.core_type<tc>, window_params = [{transform_indices = @transform_0, window_bounds = array<i64: 544, 128>}, {transform_indices = @transform_1, window_bounds = array<i64: 544, 128>}, {transform_indices = @transform_2, window_bounds = array<i64: 544, 128>}, {transform_indices = @transform_3, window_bounds = array<i64: 544, 128>}]} {
    %c0 = arith.constant 0 : index
    %c0_0 = arith.constant 0 : index
    %0 = vector.load %arg1[%c0, %c0_0] : memref<544x128xf32, #tpu.memory_space<vmem>>, vector<544x128xf32>
    %cst = arith.constant 0.000000e+00 : f32
    %1 = vector.broadcast %cst : f32 to vector<544x128xf32>
    %2 = arith.maximumf %0, %1 : vector<544x128xf32>
    %3 = math.absf %0 : vector<544x128xf32>
    %cst_1 = arith.constant 0.000000e+00 : f32
    %4 = vector.broadcast %cst_1 : f32 to vector<544x128xf32>
    %5 = arith.subf %4, %3 : vector<544x128xf32>
    %6 = math.exp %5 : vector<544x128xf32>
    %7 = math.log1p %6 : vector<544x128xf32>
    %8 = arith.addf %2, %7 : vector<544x128xf32>
    %c0_2 = arith.constant 0 : index
    %c0_3 = arith.constant 0 : index
    %9 = vector.load %arg2[%c0_2, %c0_3] : memref<544x128xf32, #tpu.memory_space<vmem>>, vector<544x128xf32>
    %c0_4 = arith.constant 0 : index
    %c0_5 = arith.constant 0 : index
    %10 = vector.load %arg3[%c0_4, %c0_5] : memref<544x128xf32, #tpu.memory_space<vmem>>, vector<544x128xf32>
    %11 = arith.subf %9, %10 : vector<544x128xf32>
    %12 = arith.mulf %8, %11 : vector<544x128xf32>
    %c0_6 = arith.constant 0 : index
    %c0_7 = arith.constant 0 : index
    %13 = vector.load %arg4[%c0_6, %c0_7] : memref<544x128xf32, #tpu.memory_space<vmem>>, vector<544x128xf32>
    tpu.vector_store %arg4[%c0_6, %c0_7], %12 {strides = array<i32>} : memref<544x128xf32, #tpu.memory_space<vmem>>, vector<544x128xf32>,
    return
  }
  func.func @transform_0(%arg0: i32) -> (i32, i32) {
    %c0_i32 = arith.constant 0 : i32
    %c0_i32_0 = arith.constant 0 : i32
    return %arg0, %c0_i32 : i32, i32
  }
  func.func @transform_1(%arg0: i32) -> (i32, i32) {
    %c0_i32 = arith.constant 0 : i32
    %c0_i32_0 = arith.constant 0 : i32
    return %arg0, %c0_i32 : i32, i32
  }
  func.func @transform_2(%arg0: i32) -> (i32, i32) {
    %c0_i32 = arith.constant 0 : i32
    %c0_i32_0 = arith.constant 0 : i32
    return %arg0, %c0_i32 : i32, i32
  }
  func.func @transform_3(%arg0: i32) -> (i32, i32) {
    %c0_i32 = arith.constant 0 : i32
    %c0_i32_0 = arith.constant 0 : i32
    return %arg0, %c0_i32 : i32, i32
  }
}

</mosaic_0001>

<bundles_post_ra>
// kernel: fn.1
= control target key start
LH: loop header
LB: loop body
LE: loop exit
PB: predicated region body
PF: predicated region fallthrough
CT: control target
= control target key end

     0   :  { %s4372_s0 = inlined_call_operand.hbm [shape: f32[1088,128], index: 0, kind: input, shape index: {}]   ;;  %s4373_s1 = inlined_call_operand.hbm [shape: f32[1088,128], index: 1, kind: input, shape index: {}]   ;;  %s4374_s2 = inlined_call_operand.hbm [shape: f32[1088,128], index: 2, kind: input, shape index: {}]   ;;  %s4375_s3 = inlined_call_operand.hbm [shape: f32[1088,128], index: 3, kind: output, shape index: {}]  }
   0x1   :  { %4391 = sst [smem:[#allocation20_spill]] %s4372_s0 }
   0x2   :  { %4392 = sst [smem:[#allocation21_spill]] %s4373_s1 }
   0x3   :  { %8 = vsyncpa [#allocation3], 0 }
   0x4   :  { %10 = vsyncpa [#allocation3 + $0x1], 0 }
   0x5   :  { %11 = vsyncpa [#allocation6], 0 }
   0x6   :  { %13 = vsyncpa [#allocation6 + $0x1], 0 }
   0x7   :  { %14 = vsyncpa [#allocation4], 0 }
   0x8   :  { %16 = vsyncpa [#allocation4 + $0x1], 0  ;;  %s2360_s12 = smov 0   ;;  %s2362_s13 = smov 0  }
   0x9   :  { %s2364_s14 = smov 0   ;;  %s2366_s15 = smov 0  }
   0xa LB: > { %s2381_s16 = sadd.s32 4294967295, %s2330_s15   ;;  %s1828_s17 = sadd.s32 4294967294, %s2330_s15   ;;  %s2330_s15 = sphi %s2366_s15, %s4579_s15   ;;  %s2326_s14 = sphi %s2364_s14, %s4578_s14   ;;  %s2322_s13 = sphi %s2362_s13, %s4577_s13   ;;  %s2318_s12 = sphi %s2360_s12, %s4576_s12  }
   0xb   : > { %s2385_s18 = sadd.s32 1, %s2330_s15   ;;  %s29_s19 = sadd.s32 1, %s2326_s14 }
   0xc   : > { %s26_s20 = ssub.s32 %s2330_s15, %s2385_s18  ;;  %p36_p0 = scmp.ne.s32.totalorder %s2326_s14, %s2322_s13 }
   0xd   : > { %p27_p1 = scmp.eq.s32.totalorder %s26_s20, 0  ;;  %p37_p2 = scmp.eq.s32.totalorder %s2330_s15, 0 }
   0xe   : > { %p42_p3 = scmp.ne.s32.totalorder %s2322_s13, %s2318_s12  ;;  %p43_p4 = scmp.eq.s32.totalorder %s2381_s16, 0 }
   0xf   : > { %s2397_s21 = scalar_select %p27_p1, %s2326_s14, %s29_s19  }
  0x10   : > { %p38_p5 = por %p37_p2, %p36_p0  ;;  %p2399_p6 = por %p43_p4, %p42_p3 }
  0x11   : > { %p118_p7 = scmp.eq.s32.totalorder %s2381_s16, 1  ;;  %p124_p8 = scmp.eq.s32.totalorder %s1828_s17, 1 }
  0x12   : > { %s4393_s22 = scalar_select %p2399_p6, 1, 0 }
  0x13   : > { %p1868_p10 = scmp.lt.s32.totalorder %s2330_s15, 2  ;;  %p2406_p11 = por %p118_p7, %p36_p0 }
  0x14   : > { %p2410_p12 = por %p124_p8, %p42_p3  ;;  %s144_s25 = sand.u32 1, %s2326_s14  }
  0x15   : > { %s4394_s23 = scalar_select %p2406_p11, 1, 0 }
  0x16   : > { %s4395_s24 = scalar_select %p2410_p12, 1, 0 }
  0x17   : > { %s2416_s26 = smul.u32 8704, %s2330_s15  ;;  %p2422_p13 = pnand %p1868_p10, %p38_p5 }
  0x18   : > { %s2420_s27 = smul.u32 544, %s144_s25  ;;  %s165_s29 = sand.u32 1, %s2330_s15  }
  0x19   : > { %s4397_s1 = sld [smem:[#allocation21_spill]]  ;;  %s2437_s8 = scalar_lea.sflag [#allocation6], %s165_s29 }
  0x1a   : > { %s169_s6 = scalar_lea.vmem [#allocation5], %s2420_s27  ;;  %p2443_p2 = pneg %p2422_p13 }
  0x1b   : > { %s176_s7 = sshll.u32 %s169_s6, 4  ;;  %s2434_s7 = int_to_ptr.vmem [resolvable:$true] %s176_s7 }
  0x1f   : > { %s2431_s5 = scalar_lea.hbm %s4397_s1, %s2416_s26  ;;  %s2183_s19 = scalar_lea.hbm %s4397_s1, 17408 }
  0x20   : > { %s2178_s9 = scalar_lea.hbm %s2431_s5, 8704  ;;  %p2184_p5 = scmp.lt.s32.totalorder %s2431_s5, %s4397_s1 }
  0x21   : > { %p2179_p1 = scmp.ne.s32.totalorder %s2431_s5, %s2178_s9  ;;  %p2185_p7 = scmp.lt.s32.totalorder %s2183_s19, %s2178_s9 }
  0x23   : > { %p2181_p3 = pnand %p2443_p2, %p2179_p1  ;;  %p2186_p8 = por %p2185_p7, %p2184_p5 }
  0x25   : > { %p2182_p4 = pneg %p2181_p3 }
  0x27   : > { %p2187_p10 = pnand %p2186_p8, %p2182_p4 }
  0x29   : > { %2190 = shalt.err (!%p2187_p10)
}
  0x2a   : > { %s2191_s29 = scalar_lea.vmem %s2434_s7, 8704  ;;  %s2332_s4 = smov [#allocation5]  }
  0x2b   : > { %p2192_p9 = scmp.ne.s32.totalorder %s2434_s7, %s2191_s29  ;;  %s2196_s6 = sshll.u32 %s2332_s4, 4  ;;  %s2197_s6 = int_to_ptr.vmem [resolvable:$false] %s2196_s6 }
  0x2c   : > { %s2198_s11 = scalar_lea.vmem %s2197_s6, 17408  ;;  %p2199_p0 = scmp.lt.s32.totalorder %s2434_s7, %s2197_s6 }
  0x2d   : > { %p2194_p1 = pnand %p2192_p9, %p2443_p2  ;;  %p2200_p12 = scmp.lt.s32.totalorder %s2198_s11, %s2191_s29 }
  0x2f   : > { %p2195_p3 = pneg %p2194_p1  ;;  %p2201_p11 = por %p2200_p12, %p2199_p0 }
  0x31   : > { %p2202_p6 = pnand %p2201_p11, %p2195_p3 }
  0x33   : > { %2205 = shalt.err (!%p2202_p6)
}
  0x34   : > { %s4378_s9 = smov 128   ;;  %s4380_s17 = smov 8  }
  0x35   : > { %1860 = dma.hbm_to_vmem [thread:$0]  (!%p2422_p13), %s2431_s5, 8704, %s2434_s7, %s2437_s8, %s4378_s9, %s4378_s9, %s4380_s17  }
  0x36   : > { %p205_p9 = scmp.lt.s32.totalorder %s2330_s15, 3  ;;  %s4399_s0 = sld [smem:[#allocation20_spill]] }
  0x37   : > { %p4400_p6 = scmp.ge.s32.totalorder %s2330_s15, 1  ;;  %s148_s4 = scalar_lea.vmem [#allocation2], %s2420_s27 }
  0x38   : > { %s155_s6 = sshll.u32 %s148_s4, 4  ;;  %s145_s5 = scalar_lea.sflag [#allocation3], %s144_s25  ;;  %s2483_s6 = int_to_ptr.vmem [resolvable:$true] %s155_s6 }
  0x39   : > { %p2478_p11 = pnand %p4400_p6, %p205_p9 }
  0x3b   : > { %s4401_s29 = scalar_select %p2478_p11, 1, 0 }
  0x3c   : > { %s2474_s30 = scalar_lea.hbm %s4399_s0, %s2416_s26  ;;  %s2211_s20 = scalar_lea.hbm %s4399_s0, 17408 }
  0x3d   : > { %s2206_s7 = scalar_lea.hbm %s2474_s30, 8704  ;;  %p2212_p5 = scmp.lt.s32.totalorder %s2474_s30, %s4399_s0 }
  0x3e   : > { %p2207_p12 = scmp.ne.s32.totalorder %s2474_s30, %s2206_s7  ;;  %p2213_p7 = scmp.lt.s32.totalorder %s2211_s20, %s2206_s7 }
  0x40   : > { %p2209_p0 = pnand %p2207_p12, %p2443_p2  ;;  %p2214_p8 = por %p2213_p7, %p2212_p5 }
  0x42   : > { %p2210_p4 = pneg %p2209_p0 }
  0x44   : > { %p2215_p10 = pnand %p2214_p8, %p2210_p4 }
  0x46   : > { %2218 = shalt.err (!%p2215_p10)
}
  0x47   : > { %s2219_s25 = scalar_lea.vmem %s2483_s6, 8704  ;;  %s2335_s4 = smov [#allocation2]  }
  0x48   : > { %p2220_p1 = scmp.ne.s32.totalorder %s2483_s6, %s2219_s25  ;;  %s2224_s11 = sshll.u32 %s2335_s4, 4  ;;  %s2225_s11 = int_to_ptr.vmem [resolvable:$false] %s2224_s11 }
  0x49   : > { %s2226_s19 = scalar_lea.vmem %s2225_s11, 17408  ;;  %p2227_p6 = scmp.lt.s32.totalorder %s2483_s6, %s2225_s11 }
  0x4a   : > { %p2222_p3 = pnand %p2220_p1, %p2443_p2  ;;  %p2228_p12 = scmp.lt.s32.totalorder %s2226_s19, %s2219_s25 }
  0x4c   : > { %p2223_p9 = pneg %p2222_p3  ;;  %p2229_p0 = por %p2228_p12, %p2227_p6 }
  0x4e   : > { %p2230_p11 = pnand %p2229_p0, %p2223_p9 }
  0x50   : > { %2233 = shalt.err (!%p2230_p11)
}
  0x51   : > { %s4402_s9 = smov 8   ;;  %s4403_s17 = smov 128  }
  0x52   : > { %1857 = dma.hbm_to_vmem [thread:$0]  (!%p2422_p13), %s2474_s30, 8704, %s2483_s6, %s145_s5, %s4403_s17, %s4403_s17, %s4402_s9  }
  0x53   : > { %s2514_s4 = scalar_lea.hbm %s4374_s2, %s2416_s26  ;;  %s190_s25 = scalar_lea.vmem [#allocation7], %s2420_s27 }
  0x54   : > { %s197_s11 = sshll.u32 %s190_s25, 4  ;;  %s2234_s19 = scalar_lea.hbm %s2514_s4, 8704  ;;  %s198_s11 = int_to_ptr.vmem [resolvable:$true] %s197_s11 }
  0x55   : > { %p2235_p11 = scmp.ne.s32.totalorder %s2514_s4, %s2234_s19  ;;  %s2239_s30 = scalar_lea.hbm %s4374_s2, 17408 }
  0x56   : > { %p2240_p7 = scmp.lt.s32.totalorder %s2514_s4, %s4374_s2  ;;  %p2241_p8 = scmp.lt.s32.totalorder %s2239_s30, %s2234_s19 }
  0x57   : > { %p2237_p4 = pnand %p2235_p11, %p2443_p2 }
  0x58   : > { %p2242_p10 = por %p2241_p8, %p2240_p7 }
  0x59   : > { %p2238_p5 = pneg %p2237_p4 }
  0x5b   : > { %p2243_p1 = pnand %p2242_p10, %p2238_p5 }
  0x5d   : > { %2246 = shalt.err (!%p2243_p1)
}
  0x5e   : > { %s2247_s26 = scalar_lea.vmem %s198_s11, 8704  ;;  %s2336_s27 = smov [#allocation7]  }
  0x5f   : > { %p2248_p3 = scmp.ne.s32.totalorder %s198_s11, %s2247_s26  ;;  %s2252_s7 = sshll.u32 %s2336_s27, 4  ;;  %s2253_s7 = int_to_ptr.vmem [resolvable:$false] %s2252_s7 }
  0x60   : > { %s2254_s20 = scalar_lea.vmem %s2253_s7, 17408  ;;  %p2255_p12 = scmp.lt.s32.totalorder %s198_s11, %s2253_s7 }
  0x61   : > { %p2250_p9 = pnand %p2248_p3, %p2443_p2  ;;  %p2256_p0 = scmp.lt.s32.totalorder %s2254_s20, %s2247_s26 }
  0x63   : > { %p2251_p6 = pneg %p2250_p9  ;;  %p2257_p11 = por %p2256_p0, %p2255_p12 }
  0x65   : > { %p2258_p4 = pnand %p2257_p11, %p2251_p6 }
  0x67   : > { %2261 = shalt.err (!%p2258_p4)
}
  0x68   : > { %1863 = dma.hbm_to_vmem [thread:$0]  (!%p2422_p13), %s2514_s4, 8704, %s198_s11, %s2437_s8, %s4403_s17, %s4403_s17, %s4402_s9  }
  0x69   : > { %p4404_p2 = scmp.ne.s32.totalorder %s4401_s29, 0 }
  0x6b   : > { %209 = sbr.rel (%p4404_p2) target bundleno = 448 (0x1c0), region = 32 }
  0x70   : > { %s2540_s0 = sand.u32 1, %s2322_s13   ;;  %p4405_p5 = scmp.ne.s32.totalorder %s4393_s22, 0 }
  0x71   : > { %s2543_s1 = smul.u32 544, %s2540_s0  ;;  %s212_s10 = scalar_lea.sflag [#allocation3], %s2540_s0 }
  0x73   : > { %s2547_s28 = scalar_lea.vmem [#allocation2], %s2543_s1 }
  0x74   : > { %2305 = dma.done.wait (%p4405_p5), %s212_s10, 8704  }
  0x75   : > { %2307 = vsyncadd (%p4405_p5), %s212_s10, 4294958592  ;;  %s220_s8 = sand.u32 1, %s2381_s16   ;;  %s2555_s9 = scalar_lea.vmem [#allocation5], %s2543_s1 }
  0x76   : > { %s221_s29 = scalar_lea.sflag [#allocation6], %s220_s8 }
  0x77   : > { %2309 = dma.done.wait (%p4405_p5), %s221_s29, 17408  }
  0x78   : > { %2311 = vsyncadd (%p4405_p5), %s221_s29, 4294949888  ;;  %v2562_v0 = vld [vmem:[%s2547_s28] sm:$0xff]  ;;  %v2566_v2 = vld [vmem:[%s2547_s28 + $0x8] sm:$0xff]  ;;  %s2595_s22 = scalar_lea.vmem [#allocation7], %s2543_s1  ;;  %s2784_s17 = scalar_lea.vmem [#allocation8], %s2543_s1 }
  0x79   : > { %v406_v1 = vand.u32 2147483647, %v2562_v0  ;;  %v407_v3 = vand.u32 2147483647, %v2566_v2  ;;  %v2570_v4 = vld [vmem:[%s2547_s28 + $0x10] sm:$0xff]  ;;  %v2574_v7 = vld [vmem:[%s2547_s28 + $0x18] sm:$0xff] }
  0x7a   : > { %v408_v6 = vand.u32 2147483647, %v2570_v4  ;;  %v409_v9 = vand.u32 2147483647, %v2574_v7  ;;  %v2578_v10 = vld [vmem:[%s2547_s28 + $0x20] sm:$0xff]  ;;  %v2582_v16 = vld [vmem:[%s2547_s28 + $0x28] sm:$0xff] }
  0x7b   : > { %v474_v5 = vsub.f32 0.0, %v406_v1  ;;  %v475_v8 = vsub.f32 0.0, %v407_v3  ;;  %v410_v15 = vand.u32 2147483647, %v2578_v10  ;;  %v411_v18 = vand.u32 2147483647, %v2582_v16 }
  0x7c   : > { %v476_v12 = vsub.f32 0.0, %v408_v6  ;;  %v477_v14 = vsub.f32 0.0, %v409_v9  ;;  %v2586_v21 = vld [vmem:[%s2547_s28 + $0x30] sm:$0xff]  ;;  %v2589_v23 = vld [vmem:[%s2547_s28 + $0x38] sm:$0xff]  ;;  %v2592_v24 = vld [vmem:[%s2555_s9] sm:$0xff]  ;;  %s1841_s4 = smul.u32 8704, %s2381_s16 }
  0x7d   : > { %v542_v11 = vmul.f32 1.442695, %v474_v5  ;;  %v544_v13 = vmul.f32 1.442695, %v475_v8  ;;  %v478_v20 = vsub.f32 0.0, %v410_v15  ;;  %v479_v22 = vsub.f32 0.0, %v411_v18 }
  0x7e   : > { %v546_v17 = vmul.f32 1.442695, %v476_v12  ;;  %v548_v19 = vmul.f32 1.442695, %v477_v14  ;;  %v2598_v25 = vld [vmem:[%s2595_s22] sm:$0xff]  ;;  %v2606_v30 = vld [vmem:[%s2555_s9 + $0x8] sm:$0xff]  ;;  %s4325_s30 = scalar_lea.hbm %s4375_s3, %s1841_s4 }
  0x7f   : > { %1906 = vpow2.f32 %v542_v11  ;;  %v550_v26 = vmul.f32 1.442695, %v478_v20  ;;  %v412_v27 = vand.u32 2147483647, %v2586_v21  ;;  %v2602_v28 = vld [vmem:[%s2547_s28 + $0x40] sm:$0xff]  ;;  %v2610_v33 = vld [vmem:[%s2595_s22 + $0x8] sm:$0xff] }
  0x80   : > { %1908 = vpow2.f32 %v544_v13  ;;  %4406 = vst [vmem:[#allocation12_spill] sm:$0xff] %v2602_v28  ;;  %v552_v31 = vmul.f32 1.442695, %v479_v22  ;;  %v413_v32 = vand.u32 2147483647, %v2589_v23  ;;  %v2613_v34 = vld [vmem:[%s2555_s9 + $0x10] sm:$0xff] }
  0x81   : > { %1910 = vpow2.f32 %v546_v17  ;;  %v480_v35 = vsub.f32 0.0, %v412_v27  ;;  %v414_v36 = vand.u32 2147483647, %v2602_v28  ;;  %v2617_v37 = vld [vmem:[%s2547_s28 + $0x48] sm:$0xff]  ;;  %v2622_v40 = vld [vmem:[%s2595_s22 + $0x10] sm:$0xff]  ;;  %v2625_v41 = vld [vmem:[%s2555_s9 + $0x18] sm:$0xff] }
  0x82   : > { %1912 = vpow2.f32 %v548_v19  ;;  %4407 = vst [vmem:[#allocation13_spill] sm:$0xff] %v2617_v37  ;;  %v481_v42 = vsub.f32 0.0, %v413_v32  ;;  %v2628_v43 = vld [vmem:[%s2547_s28 + $0x50] sm:$0xff]  ;;  %v2631_v44 = vld [vmem:[%s2595_s22 + $0x18] sm:$0xff]  ;;  %v415_v47 = vand.u32 2147483647, %v2617_v37 }
  0x83   : > { %1914 = vpow2.f32 %v550_v26  ;;  %v554_v45 = vmul.f32 1.442695, %v480_v35  ;;  %v482_v46 = vsub.f32 0.0, %v414_v36  ;;  %v2639_v50 = vld [vmem:[%s2555_s9 + $0x20] sm:$0xff]  ;;  %v416_v53 = vand.u32 2147483647, %v2628_v43 }
  0x84   : > { %1916 = vpow2.f32 %v552_v31  ;;  %v2642_v51 = vld [vmem:[%s2595_s22 + $0x20] sm:$0xff]  ;;  %v556_v52 = vmul.f32 1.442695, %v481_v42  ;;  %v2648_v55 = vld [vmem:[%s2555_s9 + $0x28] sm:$0xff]  ;;  %v483_v58 = vsub.f32 0.0, %v415_v47  ;;  %v2654_v59 = vld [vmem:[%s2547_s28 + $0x58] sm:$0xff] }
  0x85   : > { %v2651_v56 = vld [vmem:[%s2595_s22 + $0x28] sm:$0xff]  ;;  %1918 = vpow2.f32 %v554_v45  ;;  %v558_v57 = vmul.f32 1.442695, %v482_v46  ;;  %4408 = vst [vmem:[#allocation14_spill] sm:$0xff] %v2654_v59  ;;  %v2660_v62 = vld [vmem:[%s2555_s9 + $0x30] sm:$0xff]  ;;  %v2666_v1 = vld [vmem:[%s2555_s9 + $0x38] sm:$0xff] }
  0x86   : > { %v2663_v63 = vld [vmem:[%s2595_s22 + $0x30] sm:$0xff]  ;;  %1920 = vpow2.f32 %v556_v52  ;;  %v484_v3 = vsub.f32 0.0, %v416_v53  ;;  %v2672_v8 = vld [vmem:[%s2595_s22 + $0x38] sm:$0xff]  ;;  %v2675_v9 = vld [vmem:[%s2555_s9 + $0x40] sm:$0xff]  ;;  %v560_v12 = vmul.f32 1.442695, %v483_v58 }
  0x87   : > { %4409 = vst [vmem:[#allocation15_spill] sm:$0xff] %v2672_v8  ;;  %1922 = vpow2.f32 %v558_v57  ;;  %4410 = vst [vmem:[#allocation16_spill] sm:$0xff] %v2675_v9  ;;  %v2678_v11 = vld [vmem:[%s2595_s22 + $0x40] sm:$0xff]  ;;  %v417_v17 = vand.u32 2147483647, %v2654_v59  ;;  %v2697_v52 = vld [vmem:[%s2547_s28 + $0x68] sm:$0xff]  ;;  %v4447_v8 = vsub.f32 %v2660_v62, %v2663_v63 }
  0x88   : > { %4411 = vst [vmem:[#allocation17_spill] sm:$0xff] %v2678_v11  ;;  %v562_v15 = vmul.f32 1.442695, %v484_v3  ;;  %1924 = vpow2.f32 %v560_v12  ;;  %v2694_v36 = vld [vmem:[%s2547_s28 + $0x60] sm:$0xff]  ;;  %v2701_v32 = vld [vmem:[%s2555_s9 + $0x48] sm:$0xff]  ;;  %v4431_v31 = vmax.f32 %v2566_v2, 0.0 }
  0x89   : > { %v485_v3 = vsub.f32 0.0, %v417_v17  ;;  %4412 = vst [vmem:[#allocation18_spill] sm:$0xff] %v2701_v32  ;;  %v2705_v14 = vld [vmem:[%s2595_s22 + $0x48] sm:$0xff]  ;;  %v4445_v9 = vmax.f32 %v2586_v21, 0.0  ;;  %v348_v62 = vmax.f32 %v2628_v43, 0.0  ;;  %s1712_s25 = sshll.u32 %s2784_s17, 4  ;;  %s4327_s25 = int_to_ptr.vmem [resolvable:$true] %s1712_s25 }
  0x8a   : > { %1926 = vpow2.f32 %v562_v15  ;;  %4413 = vst [vmem:[#allocation19_spill] sm:$0xff] %v2705_v14  ;;  %s1699_s16 = scalar_lea.sflag [#allocation4], %s2540_s0  ;;  %s2262_s6 = scalar_lea.vmem %s4327_s25, 8704 }
  0x8b   : > { %v2708_v61 = vmul.f32 1.442695, %v485_v3  ;;  %p2263_p13 = scmp.ne.s32.totalorder %s4327_s25, %s2262_s6  ;;  %p4573_p7 = scmp.ne.s32.totalorder %s4394_s23, 0 }
  0x8c   : > { %v1907_v18 = vpop.eup %1906  ;;  %s2337_s5 = smov [#allocation8]  }
  0x8d   : > { %v1909_v26 = vpop.eup %1908  ;;  %v678_v27 = vadd.f32 1.0, %v1907_v18  ;;  %v681_v45 = vmul.f32 -0.5, %v1907_v18  ;;  %v684_v12 = vand.u32 2147483647, %v1907_v18  ;;  %p2264_p8 = pnand %p2263_p13, %p4573_p7  ;;  %s2266_s26 = sshll.u32 %s2337_s5, 4  ;;  %s2267_s26 = int_to_ptr.vmem [resolvable:$false] %s2266_s26 }
  0x8e   : > { %v1911_v42 = vpop.eup %1910  ;;  %v687_v46 = vadd.f32 1.0, %v1909_v26  ;;  %v690_v47 = vmul.f32 -0.5, %v1909_v26  ;;  %v693_v20 = vand.u32 2147483647, %v1909_v26  ;;  %s2268_s27 = scalar_lea.vmem %s2267_s26, 17408  ;;  %p2269_p1 = scmp.lt.s32.totalorder %s4327_s25, %s2267_s26 }
  0x8f   : > { %v1913_v53 = vpop.eup %1912  ;;  %1928 = vlog2.f32 %v678_v27  ;;  %v696_v57 = vadd.f32 1.0, %v1911_v42  ;;  %v699_v35 = vmul.f32 -0.5, %v1911_v42  ;;  %v682_v13 = vadd.f32 1.0, %v681_v45  ;;  %p2265_p10 = pneg %p2264_p8  ;;  %p2270_p3 = scmp.lt.s32.totalorder %s2268_s27, %s2262_s6 }
  0x90   : > { %1930 = vlog2.f32 %v687_v46  ;;  %v1915_v22 = vpop.eup %1914  ;;  %v705_v15 = vadd.f32 1.0, %v1913_v53  ;;  %v691_v6 = vadd.f32 1.0, %v690_v47  ;;  %v702_v58 = vand.u32 2147483647, %v1911_v42 }
  0x91   : > { %1932 = vlog2.f32 %v696_v57  ;;  %v1917_v27 = vpop.eup %1916  ;;  %v708_v17 = vmul.f32 -0.5, %v1913_v53  ;;  %v714_v46 = vadd.f32 1.0, %v1915_v22  ;;  %v717_v5 = vmul.f32 -0.5, %v1915_v22  ;;  %p2271_p9 = por %p2270_p3, %p2269_p1 }
  0x92   : > { %1934 = vlog2.f32 %v705_v15  ;;  %vm2710_vm0 = vcmp.lt.f32.partialorder %v684_v12, 0.0004427343  ;;  %v700_v57 = vadd.f32 1.0, %v699_v35  ;;  %v711_v60 = vand.u32 2147483647, %v1913_v53  ;;  %v1919_v19 = vpop.eup %1918 }
  0x93   : > { %vm2716_vm1 = vcmp.lt.f32.partialorder %v693_v20, 0.0004427343  ;;  %v709_v47 = vadd.f32 1.0, %v708_v17  ;;  %1936 = vlog2.f32 %v714_v46  ;;  %v723_v15 = vadd.f32 1.0, %v1917_v27  ;;  %v1921_v3 = vpop.eup %1920  ;;  %p2272_p6 = pnand %p2271_p9, %p2265_p10 }
  0x94   : > { %v726_v49 = vmul.f32 -0.5, %v1917_v27  ;;  %v683_v39 = vmul.f32 %v1907_v18, %v682_v13  ;;  %v692_v12 = vmul.f32 %v1909_v26, %v691_v6  ;;  %vm2720_vm2 = vcmp.lt.f32.partialorder %v702_v58, 0.0004427343  ;;  %v2724_v38 = vpop.eup %1922 }
  0x95   : > { %v732_v35 = vadd.f32 1.0, %v1919_v19  ;;  %v718_v54 = vadd.f32 1.0, %v717_v5  ;;  %v720_v29 = vand.u32 2147483647, %v1915_v22  ;;  %1938 = vlog2.f32 %v723_v15  ;;  %v2730_v13 = vpop.eup %1924 }
  0x96   : > { %v735_v20 = vmul.f32 -0.5, %v1919_v19  ;;  %v701_v59 = vmul.f32 %v1911_v42, %v700_v57  ;;  %vm2726_vm3 = vcmp.lt.f32.partialorder %v711_v60, 0.0004427343  ;;  %v741_v46 = vadd.f32 1.0, %v1921_v3 }
  0x97   : > { %1940 = vlog2.f32 %v732_v35  ;;  %v710_v6 = vmul.f32 %v1913_v53, %v709_v47  ;;  %v727_v18 = vadd.f32 1.0, %v726_v49  ;;  %v729_v26 = vand.u32 2147483647, %v1917_v27  ;;  %v2733_v15 = vpop.eup %1926 }
  0x98   : > { %v744_v58 = vmul.f32 -0.5, %v1921_v3  ;;  %v736_v14 = vadd.f32 1.0, %v735_v20  ;;  %v738_v32 = vand.u32 2147483647, %v1919_v19  ;;  %1942 = vlog2.f32 %v741_v46 }
  0x99   : > { %v750_v5 = vadd.f32 1.0, %v2724_v38  ;;  %v719_v42 = vmul.f32 %v1915_v22, %v718_v54  ;;  %vm2735_vm4 = vcmp.lt.f32.partialorder %v720_v29, 0.0004427343  ;;  %v747_v57 = vand.u32 2147483647, %v1921_v3 }
  0x9a   : > { %v753_v35 = vmul.f32 -0.5, %v2724_v38  ;;  %v745_v53 = vadd.f32 1.0, %v744_v58  ;;  %v759_v49 = vadd.f32 1.0, %v2730_v13  ;;  %v762_v47 = vmul.f32 -0.5, %v2730_v13 }
  0x9b   : > { %1944 = vlog2.f32 %v750_v5  ;;  %v728_v11 = vmul.f32 %v1917_v27, %v727_v18  ;;  %vm2742_vm5 = vcmp.lt.f32.partialorder %v729_v26, 0.0004427343  ;;  %v756_v29 = vand.u32 2147483647, %v2724_v38 }
  0x9c   : > { %v1929_v37 = vpop.eup %1928  ;;  %v737_v28 = vmul.f32 %v1919_v19, %v736_v14  ;;  %vm2747_vm6 = vcmp.lt.f32.partialorder %v738_v32, 0.0004427343  ;;  %1946 = vlog2.f32 %v759_v49  ;;  %vm2753_vm7 = vcmp.lt.f32.partialorder %v747_v57, 0.0004427343 }
  0x9d   : > { %v1931_v20 = vpop.eup %1930  ;;  %v680_v46 = vmul.f32 0.6931472, %v1929_v37  ;;  %v754_v27 = vadd.f32 1.0, %v753_v35  ;;  %v768_v18 = vadd.f32 1.0, %v2733_v15  ;;  %v746_v32 = vmul.f32 %v1921_v3, %v745_v53  ;;  %v2843_v37 = vld [vmem:[%s2547_s28 + $0x80] sm:$0xff]  ;;  %v2860_v35 = vld [vmem:[%s2547_s28 + $0x88] sm:$0xff] }
  0x9e   : > { %v1933_v54 = vpop.eup %1932  ;;  %v689_v22 = vmul.f32 0.6931472, %v1931_v20  ;;  %v4430_v20 = vmax.f32 %v2562_v0, 0.0  ;;  %v763_v49 = vadd.f32 1.0, %v762_v47  ;;  %vm2766_vm8 = vcmp.lt.f32.partialorder %v756_v29, 0.0004427343 }
  0x9f   : > { %v686_v58 = vsel %vm2710_vm0, %v683_v39, %v680_v46  ;;  %v698_v5 = vmul.f32 0.6931472, %v1933_v54  ;;  %v1935_v26 = vpop.eup %1934  ;;  %1948 = vlog2.f32 %v768_v18  ;;  %v4434_v45 = vsub.f32 %v2592_v24, %v2598_v25 }
  0xa0   : > { %v1290_v14 = vadd.f32 %v686_v58, %v4430_v20  ;;  %v695_v19 = vsel %vm2716_vm1, %v692_v12, %v689_v22  ;;  %v707_v46 = vmul.f32 0.6931472, %v1935_v26  ;;  %v1937_v0 = vpop.eup %1936  ;;  %v4435_v12 = vmax.f32 %v2570_v4, 0.0  ;;  %v2795_v22 = vld [vmem:[%s2547_s28 + $0x70] sm:$0xff] }
  0xa1   : > { %v1291_v39 = vadd.f32 %v695_v19, %v4431_v31  ;;  %v704_v57 = vsel %vm2720_vm2, %v701_v59, %v698_v5  ;;  %v765_v53 = vand.u32 2147483647, %v2730_v13  ;;  %v771_v48 = vmul.f32 -0.5, %v2733_v15 }
  0xa2   : > { %v1562_v3 = vmul.f32 %v4434_v45, %v1290_v14  ;;  %v1292_v2 = vadd.f32 %v704_v57, %v4435_v12  ;;  %v4436_v59 = vsub.f32 %v2606_v30, %v2610_v33  ;;  %v713_v29 = vsel %vm2726_vm3, %v710_v6, %v707_v46  ;;  %v1939_v24 = vpop.eup %1938  ;;  %v2825_v12 = vld [vmem:[%s2547_s28 + $0x78] sm:$0xff] }
  0xa3   : > { %v716_v54 = vmul.f32 0.6931472, %v1937_v0  ;;  %1950 = vpow2.f32 %v2708_v61  ;;  %v4437_v4 = vsub.f32 %v2613_v34, %v2622_v40  ;;  %v4438_v30 = vmax.f32 %v2574_v7, 0.0 }
  0xa4   : > { %v1563_v47 = vmul.f32 %v4436_v59, %v1291_v39  ;;  %1630 = vst [vmem:[%s2784_s17] sm:$0xff] %v1562_v3  ;;  %v755_v17 = vmul.f32 %v2724_v38, %v754_v27  ;;  %v764_v6 = vmul.f32 %v2730_v13, %v763_v49  ;;  %v1941_v61 = vpop.eup %1940  ;;  %v725_v5 = vmul.f32 0.6931472, %v1939_v24 }
  0xa5   : > { %v1564_v25 = vmul.f32 %v4437_v4, %v1292_v2  ;;  %v1293_v33 = vadd.f32 %v713_v29, %v4438_v30  ;;  %v722_v58 = vsel %vm2735_vm4, %v719_v42, %v716_v54  ;;  %v4439_v18 = vand.u32 2147483647, %v2694_v36  ;;  %v1943_v60 = vpop.eup %1942  ;;  %v4453_v54 = vld [vmem:[#allocation12_spill] sm:$0xff]  ;;  %v1368_v30 = vld [vmem:[%s2555_s9 + $0x50] sm:$0xff] }
  0xa6   : > { %1631 = vst [vmem:[%s2784_s17 + $0x8] sm:$0xff] %v1563_v47  ;;  %v4440_v40 = vand.u32 2147483647, %v2697_v52  ;;  %v4441_v38 = vsub.f32 %v2625_v41, %v2631_v44  ;;  %v4442_v27 = vmax.f32 %v2578_v10, 0.0  ;;  %v734_v20 = vmul.f32 0.6931472, %v1941_v61 }
  0xa7   : > { %v486_v34 = vsub.f32 0.0, %v4439_v18  ;;  %1632 = vst [vmem:[%s2784_s17 + $0x10] sm:$0xff] %v1564_v25  ;;  %v772_v14 = vadd.f32 1.0, %v771_v48  ;;  %v731_v42 = vsel %vm2742_vm5, %v728_v11, %v725_v5  ;;  %v420_v31 = vand.u32 2147483647, %v2795_v22  ;;  %v4458_v5 = vld [vmem:[#allocation17_spill] sm:$0xff] }
  0xa8   : > { %v487_v7 = vsub.f32 0.0, %v4440_v40  ;;  %v1565_v13 = vmul.f32 %v4441_v38, %v1293_v33  ;;  %v1294_v26 = vadd.f32 %v722_v58, %v4442_v27  ;;  %v4443_v41 = vsub.f32 %v2639_v50, %v2642_v51  ;;  %v1945_v0 = vpop.eup %1944  ;;  %v1436_v33 = vld [vmem:[%s2595_s22 + $0x50] sm:$0xff]  ;;  %v4460_v40 = vld [vmem:[#allocation13_spill] sm:$0xff]  ;;  %v2948_v61 = vld [vmem:[%s2555_s9 + $0x80] sm:$0xff] }
  0xa9   : > { %v566_v19 = vmul.f32 1.442695, %v486_v34  ;;  %v4444_v10 = vmax.f32 %v2582_v16, 0.0  ;;  %v740_v57 = vsel %vm2747_vm6, %v737_v28, %v734_v20  ;;  %v743_v46 = vmul.f32 0.6931472, %v1943_v60  ;;  %v1947_v21 = vpop.eup %1946  ;;  %v4462_v60 = vld [vmem:[#allocation18_spill] sm:$0xff] }
  0xaa   : > { %v568_v49 = vmul.f32 1.442695, %v487_v7  ;;  %1633 = vst [vmem:[%s2784_s17 + $0x18] sm:$0xff] %v1565_v13  ;;  %v1566_v44 = vmul.f32 %v4443_v41, %v1294_v26  ;;  %v1296_v11 = vadd.f32 %v740_v57, %v4445_v9  ;;  %v774_v45 = vand.u32 2147483647, %v2733_v15  ;;  %v2890_v57 = vld [vmem:[%s2555_s9 + $0x58] sm:$0xff] }
  0xab   : > { %v1295_v39 = vadd.f32 %v731_v42, %v4444_v10  ;;  %1952 = vpow2.f32 %v566_v19  ;;  %v488_v3 = vsub.f32 0.0, %v420_v31  ;;  %v4446_v16 = vsub.f32 %v2648_v55, %v2651_v56  ;;  %v4463_v42 = vld [vmem:[#allocation19_spill] sm:$0xff]  ;;  %v2919_v55 = vld [vmem:[%s2555_s9 + $0x70] sm:$0xff] }
  0xac   : > { %1634 = vst [vmem:[%s2784_s17 + $0x20] sm:$0xff] %v1566_v44  ;;  %v749_v28 = vsel %vm2753_vm7, %v746_v32, %v743_v46  ;;  %v752_v51 = vmul.f32 0.6931472, %v1945_v0  ;;  %1954 = vpow2.f32 %v568_v49  ;;  %v1568_v2 = vmul.f32 %v4447_v8, %v1296_v11  ;;  %v2886_v44 = vld [vmem:[%s2547_s28 + $0x90] sm:$0xff]  ;;  %v2893_v46 = vld [vmem:[%s2595_s22 + $0x58] sm:$0xff] }
  0xad   : > { %v1567_v50 = vmul.f32 %v4446_v16, %v1295_v39  ;;  %v4448_v48 = vmax.f32 %v2589_v23, 0.0  ;;  %vm2838_vm9 = vcmp.lt.f32.partialorder %v765_v53, 0.0004427343  ;;  %v570_v56 = vmul.f32 1.442695, %v488_v3  ;;  %v4451_v23 = vld [vmem:[#allocation15_spill] sm:$0xff] }
  0xae   : > { %v758_v32 = vsel %vm2766_vm8, %v755_v17, %v752_v51  ;;  %v761_v47 = vmul.f32 0.6931472, %v1947_v21  ;;  %v421_v63 = vand.u32 2147483647, %v2825_v12  ;;  %1636 = vst [vmem:[%s2784_s17 + $0x30] sm:$0xff] %v1568_v2  ;;  %v4452_v53 = vsub.f32 %v2666_v1, %v4451_v23  ;;  %v1949_v17 = vpop.eup %1948  ;;  %v2896_v9 = vld [vmem:[%s2547_s28 + $0x98] sm:$0xff] }
  0xaf   : > { %v1297_v59 = vadd.f32 %v749_v28, %v4448_v48  ;;  %1635 = vst [vmem:[%s2784_s17 + $0x28] sm:$0xff] %v1567_v50  ;;  %v4454_v24 = vmax.f32 %v4453_v54, 0.0  ;;  %v773_v25 = vmul.f32 %v2733_v15, %v772_v14  ;;  %1956 = vpow2.f32 %v570_v56  ;;  %v4457_v15 = vld [vmem:[#allocation16_spill] sm:$0xff]  ;;  %v4465_v50 = vld [vmem:[#allocation14_spill] sm:$0xff]  ;;  %v2907_v51 = vld [vmem:[%s2555_s9 + $0x68] sm:$0xff] }
  0xb0   : > { %v767_v43 = vsel %vm2838_vm9, %v764_v6, %v761_v47  ;;  %vm2864_vm10 = vcmp.lt.f32.partialorder %v774_v45, 0.0004427343  ;;  %v489_v1 = vsub.f32 0.0, %v421_v63  ;;  %v422_v58 = vand.u32 2147483647, %v2843_v37  ;;  %v2875_v6 = vpop.eup %1950  ;;  %v2899_v45 = vld [vmem:[%s2555_s9 + $0x60] sm:$0xff] }
  0xb1   : > { %v1569_v29 = vmul.f32 %v4452_v53, %v1297_v59  ;;  %v1298_v4 = vadd.f32 %v758_v32, %v4454_v24  ;;  %v4459_v18 = vsub.f32 %v4457_v15, %v4458_v5  ;;  %v4461_v7 = vmax.f32 %v4460_v40, 0.0  ;;  %v2902_v3 = vld [vmem:[%s2595_s22 + $0x60] sm:$0xff]  ;;  %v2910_v21 = vld [vmem:[%s2595_s22 + $0x68] sm:$0xff]  ;;  %v2922_v56 = vld [vmem:[%s2595_s22 + $0x70] sm:$0xff] }
  0xb2   : > { %v770_v13 = vmul.f32 0.6931472, %v1949_v17  ;;  %v1504_v27 = vsub.f32 %v1368_v30, %v1436_v33  ;;  %v572_v26 = vmul.f32 1.442695, %v489_v1  ;;  %v490_v20 = vsub.f32 0.0, %v422_v58  ;;  %v2935_v54 = vld [vmem:[%s2595_s22 + $0x78] sm:$0xff] }
  0xb3   : > { %1637 = vst [vmem:[%s2784_s17 + $0x38] sm:$0xff] %v1569_v29  ;;  %v1570_v34 = vmul.f32 %v4459_v18, %v1298_v4  ;;  %v1299_v38 = vadd.f32 %v767_v43, %v4461_v7  ;;  %v423_v14 = vand.u32 2147483647, %v2860_v35  ;;  %v4464_v19 = vsub.f32 %v4462_v60, %v4463_v42  ;;  %v2932_v29 = vld [vmem:[%s2555_s9 + $0x78] sm:$0xff]  ;;  %v2938_v24 = vld [vmem:[%s2547_s28 + $0xa0] sm:$0xff]  ;;  %v2962_v40 = vld [vmem:[%s2595_s22 + $0x88] sm:$0xff] }
  0xb4   : > { %v776_v31 = vsel %vm2864_vm10, %v773_v25, %v770_v13  ;;  %v777_v41 = vadd.f32 1.0, %v2875_v6  ;;  %1958 = vpow2.f32 %v572_v26  ;;  %v574_v39 = vmul.f32 1.442695, %v490_v20  ;;  %v2956_v18 = vld [vmem:[%s2595_s22 + $0x80] sm:$0xff]  ;;  %v2969_v20 = vld [vmem:[%s2547_s28 + $0xa8] sm:$0xff] }
  0xb5   : > { %1638 = vst [vmem:[%s2784_s17 + $0x40] sm:$0xff] %v1570_v34  ;;  %v1571_v49 = vmul.f32 %v4464_v19, %v1299_v38  ;;  %v1300_v10 = vadd.f32 %v776_v31, %v348_v62  ;;  %v491_v0 = vsub.f32 0.0, %v423_v14  ;;  %v424_v16 = vand.u32 2147483647, %v2886_v44  ;;  %v2959_v34 = vld [vmem:[%s2555_s9 + $0x88] sm:$0xff]  ;;  %v2973_v19 = vld [vmem:[%s2547_s28 + $0xb0] sm:$0xff] }
  0xb6   : > { %1960 = vlog2.f32 %v777_v41  ;;  %v349_v28 = vmax.f32 %v4465_v50, 0.0  ;;  %v1505_v48 = vsub.f32 %v2890_v57, %v2893_v46  ;;  %v350_v59 = vmax.f32 %v2694_v36, 0.0  ;;  %v3060_v36 = vld [vmem:[%s2595_s22 + $0x98] sm:$0xff] }
  0xb7   : > { %1639 = vst [vmem:[%s2784_s17 + $0x48] sm:$0xff] %v1571_v49  ;;  %v1572_v11 = vmul.f32 %v1504_v27, %v1300_v10  ;;  %1962 = vpow2.f32 %v574_v39  ;;  %v576_v8 = vmul.f32 1.442695, %v491_v0  ;;  %v492_v32 = vsub.f32 0.0, %v424_v16  ;;  %v2982_v39 = vld [vmem:[%s2555_s9 + $0x90] sm:$0xff] }
  0xb8   : > { %v2912_v2 = vpop.eup %1952  ;;  %v425_v47 = vand.u32 2147483647, %v2896_v9  ;;  %v780_v63 = vmul.f32 -0.5, %v2875_v6  ;;  %v1506_v53 = vsub.f32 %v2899_v45, %v2902_v3  ;;  %v351_v4 = vmax.f32 %v2697_v52, 0.0 }
  0xb9   : > { %1640 = vst [vmem:[%s2784_s17 + $0x50] sm:$0xff] %v1572_v11  ;;  %v2925_v62 = vpop.eup %1954  ;;  %v786_v23 = vadd.f32 1.0, %v2912_v2  ;;  %1964 = vpow2.f32 %v576_v8  ;;  %v1507_v30 = vsub.f32 %v2907_v51, %v2910_v21  ;;  %v578_v33 = vmul.f32 1.442695, %v492_v32 }
  0xba   : > { %v795_v25 = vadd.f32 1.0, %v2925_v62  ;;  %v352_v17 = vmax.f32 %v2795_v22, 0.0  ;;  %v1508_v43 = vsub.f32 %v2919_v55, %v2922_v56  ;;  %v493_v1 = vsub.f32 0.0, %v425_v47 }
  0xbb   : > { %1966 = vlog2.f32 %v786_v23  ;;  %v353_v15 = vmax.f32 %v2825_v12, 0.0  ;;  %v1509_v5 = vsub.f32 %v2932_v29, %v2935_v54  ;;  %v426_v7 = vand.u32 2147483647, %v2938_v24 }
  0xbc   : > { %v2950_v58 = vpop.eup %1956  ;;  %1968 = vlog2.f32 %v795_v25  ;;  %v781_v38 = vadd.f32 1.0, %v780_v63  ;;  %v783_v13 = vand.u32 2147483647, %v2875_v6  ;;  %v354_v26 = vmax.f32 %v2843_v37, 0.0  ;;  %v2994_v63 = vld [vmem:[%s2595_s22 + $0x90] sm:$0xff] }
  0xbd   : > { %v804_v27 = vadd.f32 1.0, %v2950_v58  ;;  %v789_v14 = vmul.f32 -0.5, %v2912_v2  ;;  %1970 = vpow2.f32 %v578_v33  ;;  %v580_v60 = vmul.f32 1.442695, %v493_v1 }
  0xbe   : > { %v494_v42 = vsub.f32 0.0, %v426_v7  ;;  %v798_v10 = vmul.f32 -0.5, %v2925_v62  ;;  %v427_v11 = vand.u32 2147483647, %v2969_v20  ;;  %v782_v8 = vmul.f32 %v2875_v6, %v781_v38 }
  0xbf   : > { %1972 = vlog2.f32 %v804_v27  ;;  %vm2988_vm11 = vcmp.lt.f32.partialorder %v783_v13, 0.0004427343  ;;  %v428_v23 = vand.u32 2147483647, %v2973_v19  ;;  %v790_v33 = vadd.f32 1.0, %v789_v14 }
  0xc0   : > { %1974 = vpow2.f32 %v580_v60  ;;  %v582_v0 = vmul.f32 1.442695, %v494_v42  ;;  %v792_v1 = vand.u32 2147483647, %v2912_v2  ;;  %v807_v38 = vmul.f32 -0.5, %v2950_v58 }
  0xc1   : > { %v2985_v16 = vpop.eup %1958  ;;  %v495_v13 = vsub.f32 0.0, %v427_v11  ;;  %v496_v60 = vsub.f32 0.0, %v428_v23  ;;  %v799_v42 = vadd.f32 1.0, %v798_v10  ;;  %v1512_v14 = vsub.f32 %v2982_v39, %v2994_v63 }
  0xc2   : > { %v813_v7 = vadd.f32 1.0, %v2985_v16  ;;  %1976 = vpow2.f32 %v582_v0  ;;  %v801_v0 = vand.u32 2147483647, %v2925_v62  ;;  %v810_v11 = vand.u32 2147483647, %v2950_v58 }
  0xc3   : > { %v1961_v25 = vpop.eup %1960  ;;  %v586_v23 = vmul.f32 1.442695, %v496_v60  ;;  %vm3015_vm12 = vcmp.lt.f32.partialorder %v792_v1, 0.0004427343  ;;  %v819_v60 = vand.u32 2147483647, %v2985_v16  ;;  %v4480_v37 = vsub.f32 %v2948_v61, %v2956_v18 }
  0xc4   : > { %v2999_v27 = vpop.eup %1962  ;;  %v779_v6 = vmul.f32 0.6931472, %v1961_v25  ;;  %1978 = vlog2.f32 %v813_v7  ;;  %v584_v25 = vmul.f32 1.442695, %v495_v13  ;;  %v791_v7 = vmul.f32 %v2912_v2, %v790_v33  ;;  %v3021_v13 = vld [vmem:[%s2547_s28 + $0xb8] sm:$0xff] }
  0xc5   : > { %v822_v47 = vadd.f32 1.0, %v2999_v27  ;;  %vm3028_vm13 = vcmp.lt.f32.partialorder %v801_v0, 0.0004427343  ;;  %v825_v1 = vmul.f32 -0.5, %v2999_v27  ;;  %vm3034_vm14 = vcmp.lt.f32.partialorder %v810_v11, 0.0004427343 }
  0xc6   : > { %v785_v41 = vsel %vm2988_vm11, %v782_v8, %v779_v6  ;;  %v3009_v49 = vpop.eup %1964  ;;  %v808_v8 = vadd.f32 1.0, %v807_v38  ;;  %v429_v46 = vand.u32 2147483647, %v3021_v13  ;;  %vm3081_vm15 = vcmp.lt.f32.partialorder %v819_v60, 0.0004427343 }
  0xc7   : > { %v1301_v10 = vadd.f32 %v785_v41, %v349_v28  ;;  %1980 = vlog2.f32 %v822_v47  ;;  %v831_v6 = vadd.f32 1.0, %v3009_v49  ;;  %v800_v28 = vmul.f32 %v2925_v62, %v799_v42 }
  0xc8   : > { %v1967_v31 = vpop.eup %1966  ;;  %v816_v41 = vmul.f32 -0.5, %v2985_v16  ;;  %1982 = vpow2.f32 %v584_v25  ;;  %v834_v42 = vmul.f32 -0.5, %v3009_v49  ;;  %v837_v33 = vand.u32 2147483647, %v3009_v49 }
  0xc9   : > { %v1573_v50 = vmul.f32 %v1505_v48, %v1301_v10  ;;  %v1969_v2 = vpop.eup %1968  ;;  %v788_v47 = vmul.f32 0.6931472, %v1967_v31  ;;  %1984 = vlog2.f32 %v831_v6  ;;  %v809_v31 = vmul.f32 %v2950_v58, %v808_v8  ;;  %v3052_v6 = vld [vmem:[%s2555_s9 + $0x98] sm:$0xff] }
  0xca   : > { %v797_v38 = vmul.f32 0.6931472, %v1969_v2  ;;  %1986 = vpow2.f32 %v586_v23  ;;  %v3039_v48 = vpop.eup %1970  ;;  %v817_v11 = vadd.f32 1.0, %v816_v41  ;;  %v826_v8 = vadd.f32 1.0, %v825_v1 }
  0xcb   : > { %1641 = vst [vmem:[%s2784_s17 + $0x58] sm:$0xff] %v1573_v50  ;;  %v794_v62 = vsel %vm3015_vm12, %v791_v7, %v788_v47  ;;  %v840_v23 = vadd.f32 1.0, %v3039_v48  ;;  %v828_v50 = vand.u32 2147483647, %v2999_v27  ;;  %v497_v41 = vsub.f32 0.0, %v429_v46 }
  0xcc   : > { %v1973_v0 = vpop.eup %1972  ;;  %v1302_v25 = vadd.f32 %v794_v62, %v350_v59  ;;  %v803_v10 = vsel %vm3028_vm13, %v800_v28, %v797_v38  ;;  %v835_v47 = vadd.f32 1.0, %v834_v42  ;;  %v818_v3 = vmul.f32 %v2985_v16, %v817_v11  ;;  %v3115_v11 = vld [vmem:[%s2555_s9 + $0xa0] sm:$0xff] }
  0xcd   : > { %v3054_v7 = vpop.eup %1974  ;;  %v1303_v58 = vadd.f32 %v803_v10, %v351_v4  ;;  %v806_v32 = vmul.f32 0.6931472, %v1973_v0  ;;  %1988 = vlog2.f32 %v840_v23  ;;  %v827_v21 = vmul.f32 %v2999_v27, %v826_v8  ;;  %v3118_v23 = vld [vmem:[%s2595_s22 + $0xa0] sm:$0xff] }
  0xce   : > { %v1574_v59 = vmul.f32 %v1506_v53, %v1302_v25  ;;  %v849_v28 = vadd.f32 1.0, %v3054_v7  ;;  %v1513_v53 = vsub.f32 %v3052_v6, %v3060_v36  ;;  %v852_v57 = vmul.f32 -0.5, %v3054_v7 }
  0xcf   : > { %v3066_v2 = vpop.eup %1976  ;;  %v1575_v52 = vmul.f32 %v1507_v30, %v1303_v58  ;;  %v812_v4 = vsel %vm3034_vm14, %v809_v31, %v806_v32  ;;  %v843_v30 = vmul.f32 -0.5, %v3039_v48  ;;  %v588_v46 = vmul.f32 1.442695, %v497_v41 }
  0xd0   : > { %1642 = vst [vmem:[%s2784_s17 + $0x60] sm:$0xff] %v1574_v59  ;;  %v1304_v45 = vadd.f32 %v812_v4, %v352_v17  ;;  %1990 = vlog2.f32 %v849_v28  ;;  %v858_v22 = vadd.f32 1.0, %v3066_v2  ;;  %v3089_v17 = vld [vmem:[%s2547_s28 + $0xc0] sm:$0xff]  ;;  %vm3095_vm0 = vcmp.lt.f32.partialorder %v828_v50, 0.0004427343 }
  0xd1   : > { %v1979_v1 = vpop.eup %1978  ;;  %1643 = vst [vmem:[%s2784_s17 + $0x68] sm:$0xff] %v1575_v52  ;;  %v836_v27 = vmul.f32 %v3009_v49, %v835_v47  ;;  %vm3100_vm1 = vcmp.lt.f32.partialorder %v837_v33, 0.0004427343  ;;  %v844_v25 = vadd.f32 1.0, %v843_v30  ;;  %v846_v49 = vand.u32 2147483647, %v3039_v48 }
  0xd2   : > { %v1576_v16 = vmul.f32 %v1508_v43, %v1304_v45  ;;  %v815_v38 = vmul.f32 0.6931472, %v1979_v1  ;;  %1992 = vlog2.f32 %v858_v22  ;;  %v430_v43 = vand.u32 2147483647, %v3089_v17  ;;  %v3136_v45 = vld [vmem:[%s2547_s28 + $0xc8] sm:$0xff]  ;;  %v3152_v30 = vld [vmem:[%s2547_s28 + $0xd8] sm:$0xff] }
  0xd3   : > { %1994 = vpow2.f32 %v588_v46  ;;  %v861_v10 = vmul.f32 -0.5, %v3066_v2  ;;  %v853_v8 = vadd.f32 1.0, %v852_v57  ;;  %v855_v50 = vand.u32 2147483647, %v3054_v7 }
  0xd4   : > { %v1981_v62 = vpop.eup %1980  ;;  %1644 = vst [vmem:[%s2784_s17 + $0x70] sm:$0xff] %v1576_v16  ;;  %v821_v55 = vsel %vm3081_vm15, %v818_v3, %v815_v38  ;;  %v498_v52 = vsub.f32 0.0, %v430_v43  ;;  %v358_v4 = vmax.f32 %v2938_v24, 0.0  ;;  %v1514_v47 = vsub.f32 %v3115_v11, %v3118_v23 }
  0xd5   : > { %v824_v56 = vmul.f32 0.6931472, %v1981_v62  ;;  %v3108_v42 = vpop.eup %1982  ;;  %v1305_v0 = vadd.f32 %v821_v55, %v353_v15  ;;  %v864_v24 = vand.u32 2147483647, %v3066_v2  ;;  %v845_v1 = vmul.f32 %v3039_v48, %v844_v25  ;;  %v3176_v55 = vld [vmem:[%s2547_s28 + $0xe0] sm:$0xff] }
  0xd6   : > { %v1985_v58 = vpop.eup %1984  ;;  %v867_v12 = vadd.f32 1.0, %v3108_v42  ;;  %v590_v51 = vmul.f32 1.442695, %v498_v52  ;;  %vm3155_vm2 = vcmp.lt.f32.partialorder %v846_v49, 0.0004427343  ;;  %v854_v22 = vmul.f32 %v3054_v7, %v853_v8 }
  0xd7   : > { %v830_v32 = vsel %vm3095_vm0, %v827_v21, %v824_v56  ;;  %v3124_v15 = vpop.eup %1986  ;;  %v1577_v59 = vmul.f32 %v1509_v5, %v1305_v0  ;;  %v833_v41 = vmul.f32 0.6931472, %v1985_v58  ;;  %v862_v5 = vadd.f32 1.0, %v861_v10  ;;  %v3149_v21 = vld [vmem:[%s2547_s28 + $0xd0] sm:$0xff] }
  0xd8   : > { %v1306_v28 = vadd.f32 %v830_v32, %v354_v26  ;;  %1996 = vlog2.f32 %v867_v12  ;;  %v876_v33 = vadd.f32 1.0, %v3124_v15  ;;  %v4481_v26 = vmax.f32 %v2860_v35, 0.0  ;;  %v1448_v35 = vld [vmem:[%s2595_s22 + $0xb0] sm:$0xff] }
  0xd9   : > { %1645 = vst [vmem:[%s2784_s17 + $0x78] sm:$0xff] %v1577_v59  ;;  %v839_v54 = vsel %vm3100_vm1, %v836_v27, %v833_v41  ;;  %vm3160_vm3 = vcmp.lt.f32.partialorder %v855_v50, 0.0004427343  ;;  %v431_v48 = vand.u32 2147483647, %v3136_v45  ;;  %v4486_v16 = vsub.f32 %v2959_v34, %v2962_v40 }
  0xda   : > { %v1578_v29 = vmul.f32 %v4480_v37, %v1306_v28  ;;  %v1307_v3 = vadd.f32 %v839_v54, %v4481_v26  ;;  %1998 = vlog2.f32 %v876_v33  ;;  %v1989_v61 = vpop.eup %1988  ;;  %v870_v46 = vmul.f32 -0.5, %v3108_v42  ;;  %v1379_v33 = vld [vmem:[%s2555_s9 + $0xa8] sm:$0xff] }
  0xdb   : > { %v842_v57 = vmul.f32 0.6931472, %v1989_v61  ;;  %2000 = vpow2.f32 %v590_v51  ;;  %v863_v31 = vmul.f32 %v3066_v2, %v862_v5  ;;  %vm3170_vm4 = vcmp.lt.f32.partialorder %v864_v24, 0.0004427343  ;;  %v1447_v37 = vld [vmem:[%s2595_s22 + $0xa8] sm:$0xff] }
  0xdc   : > { %1646 = vst [vmem:[%s2784_s17 + $0x80] sm:$0xff] %v1578_v29  ;;  %v1579_v38 = vmul.f32 %v4486_v16, %v1307_v3  ;;  %v499_v7 = vsub.f32 0.0, %v431_v48  ;;  %v432_v60 = vand.u32 2147483647, %v3149_v21  ;;  %v879_v56 = vmul.f32 -0.5, %v3124_v15  ;;  %v3209_v51 = vld [vmem:[%s2547_s28 + $0xe8] sm:$0xff] }
  0xdd   : > { %v1991_v62 = vpop.eup %1990  ;;  %v848_v34 = vsel %vm3155_vm2, %v845_v1, %v842_v57  ;;  %v433_v2 = vand.u32 2147483647, %v3152_v30  ;;  %v4489_v43 = vmax.f32 %v2886_v44, 0.0  ;;  %v873_v25 = vand.u32 2147483647, %v3108_v42  ;;  %v3226_v48 = vld [vmem:[%s2547_s28 + $0xf8] sm:$0xff] }
  0xde   : > { %1647 = vst [vmem:[%s2784_s17 + $0x88] sm:$0xff] %v1579_v38  ;;  %v851_v40 = vmul.f32 0.6931472, %v1991_v62  ;;  %v592_v49 = vmul.f32 1.442695, %v499_v7  ;;  %v500_v10 = vsub.f32 0.0, %v432_v60  ;;  %v1515_v36 = vsub.f32 %v1379_v33, %v1447_v37 }
  0xdf   : > { %v1308_v0 = vadd.f32 %v848_v34, %v4489_v43  ;;  %v1993_v58 = vpop.eup %1992  ;;  %v871_v8 = vadd.f32 1.0, %v870_v46  ;;  %v501_v50 = vsub.f32 0.0, %v433_v2  ;;  %v434_v12 = vand.u32 2147483647, %v3176_v55  ;;  %v3246_v2 = vld [vmem:[%s2555_s9 + $0xb8] sm:$0xff]  ;;  %v3271_v37 = vld [vmem:[%s2595_s22 + $0xc8] sm:$0xff] }
  0xe0   : > { %v857_v32 = vsel %vm3160_vm3, %v854_v22, %v851_v40  ;;  %v3189_v59 = vpop.eup %1994  ;;  %v4490_v28 = vmax.f32 %v2896_v9, 0.0  ;;  %v860_v52 = vmul.f32 0.6931472, %v1993_v58  ;;  %2002 = vpow2.f32 %v592_v49  ;;  %v1380_v22 = vld [vmem:[%s2555_s9 + $0xb0] sm:$0xff]  ;;  %v3249_v43 = vld [vmem:[%s2595_s22 + $0xb8] sm:$0xff]  ;;  %v3252_v49 = vld [vmem:[%s2547_s28 + $0x100] sm:$0xff] }
  0xe1   : > { %v1580_v44 = vmul.f32 %v1512_v14, %v1308_v0  ;;  %v880_v29 = vadd.f32 1.0, %v879_v56  ;;  %v882_v54 = vand.u32 2147483647, %v3124_v15  ;;  %v885_v5 = vadd.f32 1.0, %v3189_v59  ;;  %v3255_v58 = vld [vmem:[%s2555_s9 + $0xc0] sm:$0xff] }
  0xe2   : > { %v1309_v41 = vadd.f32 %v857_v32, %v4490_v28  ;;  %v594_v24 = vmul.f32 1.442695, %v500_v10  ;;  %v866_v9 = vsel %vm3170_vm4, %v863_v31, %v860_v52  ;;  %v596_v63 = vmul.f32 1.442695, %v501_v50 }
  0xe3   : > { %1648 = vst [vmem:[%s2784_s17 + $0x90] sm:$0xff] %v1580_v44  ;;  %v502_v14 = vsub.f32 0.0, %v434_v12  ;;  %v1310_v26 = vadd.f32 %v866_v9, %v358_v4  ;;  %v359_v3 = vmax.f32 %v2969_v20, 0.0  ;;  %v872_v1 = vmul.f32 %v3108_v42, %v871_v8  ;;  %v3217_v4 = vld [vmem:[%s2547_s28 + $0xf0] sm:$0xff]  ;;  %v3260_v12 = vld [vmem:[%s2595_s22 + $0xc0] sm:$0xff]  ;;  %v3263_v44 = vld [vmem:[%s2555_s9 + $0xc8] sm:$0xff] }
  0xe4   : > { %v1581_v39 = vmul.f32 %v1513_v53, %v1309_v41  ;;  %2004 = vlog2.f32 %v885_v5  ;;  %vm3212_vm5 = vcmp.lt.f32.partialorder %v873_v25, 0.0004427343  ;;  %v881_v18 = vmul.f32 %v3124_v15, %v880_v29  ;;  %v3279_v9 = vld [vmem:[%s2555_s9 + $0xd0] sm:$0xff] }
  0xe5   : > { %v1997_v61 = vpop.eup %1996  ;;  %2006 = vpow2.f32 %v594_v24  ;;  %v598_v53 = vmul.f32 1.442695, %v502_v14  ;;  %v1582_v20 = vmul.f32 %v1514_v47, %v1310_v26  ;;  %v360_v38 = vmax.f32 %v2973_v19, 0.0 }
  0xe6   : > { %1649 = vst [vmem:[%s2784_s17 + $0x98] sm:$0xff] %v1581_v39  ;;  %v869_v42 = vmul.f32 0.6931472, %v1997_v61  ;;  %2008 = vpow2.f32 %v596_v63  ;;  %vm3229_vm6 = vcmp.lt.f32.partialorder %v882_v54, 0.0004427343  ;;  %v888_v47 = vmul.f32 -0.5, %v3189_v59 }
  0xe7   : > { %v1999_v16 = vpop.eup %1998  ;;  %2010 = vpow2.f32 %v598_v53  ;;  %v435_v11 = vand.u32 2147483647, %v3209_v51  ;;  %1650 = vst [vmem:[%s2784_s17 + $0xa0] sm:$0xff] %v1582_v20  ;;  %v436_v46 = vand.u32 2147483647, %v3217_v4  ;;  %v1516_v31 = vsub.f32 %v1380_v22, %v1448_v35  ;;  %v3301_v53 = vld [vmem:[%s2547_s28 + $0x108] sm:$0xff] }
  0xe8   : > { %v875_v23 = vsel %vm3212_vm5, %v872_v1, %v869_v42  ;;  %v878_v15 = vmul.f32 0.6931472, %v1999_v16  ;;  %v3239_v19 = vpop.eup %2000  ;;  %v437_v7 = vand.u32 2147483647, %v3226_v48  ;;  %v889_v10 = vadd.f32 1.0, %v888_v47  ;;  %v3292_v1 = vld [vmem:[%s2595_s22 + $0xd8] sm:$0xff] }
  0xe9   : > { %v1311_v62 = vadd.f32 %v875_v23, %v359_v3  ;;  %v503_v27 = vsub.f32 0.0, %v435_v11  ;;  %v894_v34 = vadd.f32 1.0, %v3239_v19  ;;  %v504_v25 = vsub.f32 0.0, %v436_v46  ;;  %v3289_v3 = vld [vmem:[%s2555_s9 + $0xd8] sm:$0xff]  ;;  %v3319_v47 = vld [vmem:[%s2595_s22 + $0xe0] sm:$0xff] }
  0xea   : > { %v884_v60 = vsel %vm3229_vm6, %v881_v18, %v878_v15  ;;  %v505_v32 = vsub.f32 0.0, %v437_v7  ;;  %v891_v50 = vand.u32 2147483647, %v3189_v59  ;;  %v361_v52 = vmax.f32 %v3021_v13, 0.0  ;;  %v3282_v13 = vld [vmem:[%s2595_s22 + $0xd0] sm:$0xff]  ;;  %v3316_v15 = vld [vmem:[%s2555_s9 + $0xe0] sm:$0xff] }
  0xeb   : > { %v1583_v40 = vmul.f32 %v1515_v36, %v1311_v62  ;;  %v1312_v56 = vadd.f32 %v884_v60, %v360_v38  ;;  %v600_v0 = vmul.f32 1.442695, %v503_v27  ;;  %2012 = vlog2.f32 %v894_v34 }
  0xec   : > { %v602_v28 = vmul.f32 1.442695, %v504_v25  ;;  %v1517_v33 = vsub.f32 %v3246_v2, %v3249_v43  ;;  %v604_v29 = vmul.f32 1.442695, %v505_v32  ;;  %v438_v54 = vand.u32 2147483647, %v3252_v49 }
  0xed   : > { %1651 = vst [vmem:[%s2784_s17 + $0xa8] sm:$0xff] %v1583_v40  ;;  %v1584_v8 = vmul.f32 %v1516_v31, %v1312_v56  ;;  %2014 = vpow2.f32 %v600_v0  ;;  %v3265_v41 = vpop.eup %2002  ;;  %v362_v5 = vmax.f32 %v3089_v17, 0.0  ;;  %v897_v24 = vmul.f32 -0.5, %v3239_v19  ;;  %v3330_v56 = vld [vmem:[%s2547_s28 + $0x110] sm:$0xff] }
  0xee   : > { %v903_v39 = vadd.f32 1.0, %v3265_v41  ;;  %2016 = vpow2.f32 %v602_v28  ;;  %v890_v63 = vmul.f32 %v3189_v59, %v889_v10  ;;  %v1518_v14 = vsub.f32 %v3255_v58, %v3260_v12 }
  0xef   : > { %1652 = vst [vmem:[%s2784_s17 + $0xb0] sm:$0xff] %v1584_v8  ;;  %v363_v26 = vmax.f32 %v3136_v45, 0.0  ;;  %2018 = vpow2.f32 %v604_v29  ;;  %vm3294_vm7 = vcmp.lt.f32.partialorder %v891_v50, 0.0004427343  ;;  %v1519_v59 = vsub.f32 %v3263_v44, %v3271_v37 }
  0xf0   : > { %2020 = vlog2.f32 %v903_v39  ;;  %v506_v36 = vsub.f32 0.0, %v438_v54  ;;  %v364_v18 = vmax.f32 %v3149_v21, 0.0  ;;  %v1520_v22 = vsub.f32 %v3279_v9, %v3282_v13  ;;  %v3445_v9 = vld [vmem:[%s2547_s28 + $0x130] sm:$0xff] }
  0xf1   : > { %v2005_v61 = vpop.eup %2004  ;;  %v365_v35 = vmax.f32 %v3152_v30, 0.0  ;;  %v898_v38 = vadd.f32 1.0, %v897_v24  ;;  %v906_v57 = vmul.f32 -0.5, %v3265_v41  ;;  %v1521_v23 = vsub.f32 %v3289_v3, %v3292_v1 }
  0xf2   : > { %v3303_v20 = vpop.eup %2006  ;;  %v887_v42 = vmul.f32 0.6931472, %v2005_v61  ;;  %v900_v31 = vand.u32 2147483647, %v3239_v19  ;;  %v439_v7 = vand.u32 2147483647, %v3301_v53  ;;  %v1522_v0 = vsub.f32 %v3316_v15, %v3319_v47 }
  0xf3   : > { %v3309_v16 = vpop.eup %2008  ;;  %v912_v11 = vadd.f32 1.0, %v3303_v20  ;;  %v909_v34 = vand.u32 2147483647, %v3265_v41  ;;  %v606_v40 = vmul.f32 1.442695, %v506_v36  ;;  %v366_v2 = vmax.f32 %v3176_v55, 0.0 }
  0xf4   : > { %v3321_v46 = vpop.eup %2010  ;;  %v893_v62 = vsel %vm3294_vm7, %v890_v63, %v887_v42  ;;  %v921_v27 = vadd.f32 1.0, %v3309_v16  ;;  %v899_v10 = vmul.f32 %v3239_v19, %v898_v38  ;;  %v907_v32 = vadd.f32 1.0, %v906_v57 }
  0xf5   : > { %v1313_v60 = vadd.f32 %v893_v62, %v361_v52  ;;  %2022 = vlog2.f32 %v912_v11  ;;  %v930_v43 = vadd.f32 1.0, %v3321_v46  ;;  %v915_v8 = vmul.f32 -0.5, %v3303_v20 }
  0xf6   : > { %2024 = vlog2.f32 %v921_v27  ;;  %v924_v50 = vmul.f32 -0.5, %v3309_v16  ;;  %v507_v28 = vsub.f32 0.0, %v439_v7  ;;  %v440_v52 = vand.u32 2147483647, %v3330_v56 }
  0xf7   : > { %v1585_v25 = vmul.f32 %v1517_v33, %v1313_v60  ;;  %2026 = vlog2.f32 %v930_v43  ;;  %vm3341_vm8 = vcmp.lt.f32.partialorder %v900_v31, 0.0004427343  ;;  %vm3345_vm9 = vcmp.lt.f32.partialorder %v909_v34, 0.0004427343  ;;  %v3351_v33 = vld [vmem:[%s2547_s28 + $0x118] sm:$0xff]  ;;  %v3365_v60 = vld [vmem:[%s2555_s9 + $0xe8] sm:$0xff] }
  0xf8   : > { %v2013_v29 = vpop.eup %2012  ;;  %v367_v19 = vmax.f32 %v3209_v51, 0.0  ;;  %2028 = vpow2.f32 %v606_v40  ;;  %v933_v61 = vmul.f32 -0.5, %v3321_v46  ;;  %v608_v6 = vmul.f32 1.442695, %v507_v28  ;;  %v3368_v34 = vld [vmem:[%s2595_s22 + $0xe8] sm:$0xff] }
  0xf9   : > { %1653 = vst [vmem:[%s2784_s17 + $0xb8] sm:$0xff] %v1585_v25  ;;  %v896_v63 = vmul.f32 0.6931472, %v2013_v29  ;;  %v508_v36 = vsub.f32 0.0, %v440_v52  ;;  %v908_v42 = vmul.f32 %v3265_v41, %v907_v32  ;;  %v918_v38 = vand.u32 2147483647, %v3303_v20 }
  0xfa   : > { %v3353_v39 = vpop.eup %2014  ;;  %v927_v57 = vand.u32 2147483647, %v3309_v16  ;;  %v916_v27 = vadd.f32 1.0, %v915_v8  ;;  %v925_v7 = vadd.f32 1.0, %v924_v50  ;;  %2030 = vpow2.f32 %v608_v6  ;;  %v3398_v6 = vld [vmem:[%s2547_s28 + $0x120] sm:$0xff] }
  0xfb   : > { %v939_v11 = vadd.f32 1.0, %v3353_v39  ;;  %v3360_v62 = vpop.eup %2016  ;;  %v902_v31 = vsel %vm3341_vm8, %v899_v10, %v896_v63  ;;  %v936_v43 = vand.u32 2147483647, %v3321_v46  ;;  %v441_v25 = vand.u32 2147483647, %v3351_v33 }
  0xfc   : > { %v3370_v40 = vpop.eup %2018  ;;  %v1314_v41 = vadd.f32 %v902_v31, %v362_v5  ;;  %v934_v10 = vadd.f32 1.0, %v933_v61  ;;  %v948_v8 = vadd.f32 1.0, %v3360_v62  ;;  %v610_v28 = vmul.f32 1.442695, %v508_v36 }
  0xfd   : > { %2032 = vlog2.f32 %v939_v11  ;;  %v2021_v32 = vpop.eup %2020  ;;  %v957_v50 = vadd.f32 1.0, %v3370_v40  ;;  %v942_v5 = vmul.f32 -0.5, %v3353_v39  ;;  %v1523_v29 = vsub.f32 %v3365_v60, %v3368_v34 }
  0xfe   : > { %v1586_v52 = vmul.f32 %v1518_v14, %v1314_v41  ;;  %v905_v17 = vmul.f32 0.6931472, %v2021_v32  ;;  %v917_v54 = vmul.f32 %v3303_v20, %v916_v27  ;;  %vm3385_vm10 = vcmp.lt.f32.partialorder %v918_v38, 0.0004427343  ;;  %v3418_v32 = vld [vmem:[%s2547_s28 + $0x128] sm:$0xff] }
  0xff   : > { %vm3389_vm11 = vcmp.lt.f32.partialorder %v927_v57, 0.0004427343  ;;  %2034 = vlog2.f32 %v948_v8  ;;  %v926_v12 = vmul.f32 %v3309_v16, %v925_v7  ;;  %v509_v14 = vsub.f32 0.0, %v441_v25 }
 0x100   : > { %1654 = vst [vmem:[%s2784_s17 + $0xc0] sm:$0xff] %v1586_v52  ;;  %v911_v58 = vsel %vm3345_vm9, %v908_v42, %v905_v17  ;;  %2036 = vlog2.f32 %v957_v50  ;;  %v935_v38 = vmul.f32 %v3321_v46, %v934_v10  ;;  %vm3403_vm12 = vcmp.lt.f32.partialorder %v936_v43, 0.0004427343 }
 0x101   : > { %v1315_v36 = vadd.f32 %v911_v58, %v363_v26  ;;  %2038 = vpow2.f32 %v610_v28  ;;  %v943_v16 = vadd.f32 1.0, %v942_v5  ;;  %v951_v11 = vmul.f32 -0.5, %v3360_v62 }
 0x102   : > { %v2023_v20 = vpop.eup %2022  ;;  %v612_v31 = vmul.f32 1.442695, %v509_v14  ;;  %v945_v46 = vand.u32 2147483647, %v3353_v39  ;;  %v442_v27 = vand.u32 2147483647, %v3398_v6 }
 0x103   : > { %v2025_v24 = vpop.eup %2024  ;;  %v914_v42 = vmul.f32 0.6931472, %v2023_v20  ;;  %v1587_v45 = vmul.f32 %v1519_v59, %v1315_v36  ;;  %v954_v43 = vand.u32 2147483647, %v3360_v62  ;;  %v960_v25 = vmul.f32 -0.5, %v3370_v40  ;;  %v1389_v20 = vld [vmem:[%s2555_s9 + $0xf8] sm:$0xff] }
 0x104   : > { %v923_v26 = vmul.f32 0.6931472, %v2025_v24  ;;  %v2027_v7 = vpop.eup %2026  ;;  %2040 = vpow2.f32 %v612_v31  ;;  %v510_v8 = vsub.f32 0.0, %v442_v27  ;;  %v944_v28 = vmul.f32 %v3353_v39, %v943_v16  ;;  %v1457_v36 = vld [vmem:[%s2595_s22 + $0xf8] sm:$0xff] }
 0x105   : > { %v920_v41 = vsel %vm3385_vm10, %v917_v54, %v914_v42  ;;  %v3420_v10 = vpop.eup %2028  ;;  %1655 = vst [vmem:[%s2784_s17 + $0xc8] sm:$0xff] %v1587_v45  ;;  %v932_v59 = vmul.f32 0.6931472, %v2027_v7  ;;  %v952_v52 = vadd.f32 1.0, %v951_v11  ;;  %v443_v54 = vand.u32 2147483647, %v3418_v32 }
 0x106   : > { %v1316_v44 = vadd.f32 %v920_v41, %v364_v18  ;;  %v929_v37 = vsel %vm3389_vm11, %v926_v12, %v923_v26  ;;  %v966_v17 = vadd.f32 1.0, %v3420_v10  ;;  %v614_v5 = vmul.f32 1.442695, %v510_v8  ;;  %v3492_v7 = vld [vmem:[%s2595_s22 + $0x100] sm:$0xff]  ;;  %v3503_v8 = vld [vmem:[%s2547_s28 + $0x138] sm:$0xff] }
 0x107   : > { %v1317_v50 = vadd.f32 %v929_v37, %v365_v35  ;;  %v938_v18 = vsel %vm3403_vm12, %v935_v38, %v932_v59  ;;  %v3437_v30 = vpop.eup %2030  ;;  %v961_v63 = vadd.f32 1.0, %v960_v25  ;;  %vm3448_vm13 = vcmp.lt.f32.partialorder %v945_v46, 0.0004427343 }
 0x108   : > { %v1588_v21 = vmul.f32 %v1520_v22, %v1316_v44  ;;  %v1318_v39 = vadd.f32 %v938_v18, %v366_v2  ;;  %2042 = vlog2.f32 %v966_v17  ;;  %v368_v61 = vmax.f32 %v3217_v4, 0.0  ;;  %v1388_v2 = vld [vmem:[%s2555_s9 + $0xf0] sm:$0xff]  ;;  %v3509_v17 = vld [vmem:[%s2555_s9 + $0x108] sm:$0xff] }
 0x109   : > { %v1589_v35 = vmul.f32 %v1521_v23, %v1317_v50  ;;  %v963_v3 = vand.u32 2147483647, %v3370_v40  ;;  %v975_v55 = vadd.f32 1.0, %v3437_v30  ;;  %v369_v58 = vmax.f32 %v3226_v48, 0.0  ;;  %v1456_v4 = vld [vmem:[%s2595_s22 + $0xf0] sm:$0xff] }
 0x10a   : > { %v2033_v13 = vpop.eup %2032  ;;  %1656 = vst [vmem:[%s2784_s17 + $0xd0] sm:$0xff] %v1588_v21  ;;  %v1590_v1 = vmul.f32 %v1522_v0, %v1318_v39  ;;  %2044 = vpow2.f32 %v614_v5  ;;  %v953_v12 = vmul.f32 %v3360_v62, %v952_v52  ;;  %vm3462_vm14 = vcmp.lt.f32.partialorder %v954_v43, 0.0004427343  ;;  %v3512_v21 = vld [vmem:[%s2595_s22 + $0x108] sm:$0xff]  ;;  %v3516_v5 = vld [vmem:[%s2547_s28 + $0x140] sm:$0xff] }
 0x10b   : > { %1657 = vst [vmem:[%s2784_s17 + $0xd8] sm:$0xff] %v1589_v35  ;;  %v941_v23 = vmul.f32 0.6931472, %v2033_v13  ;;  %2046 = vlog2.f32 %v975_v55  ;;  %v511_v38 = vsub.f32 0.0, %v443_v54  ;;  %v962_v48 = vmul.f32 %v3370_v40, %v961_v63  ;;  %v3520_v63 = vld [vmem:[%s2555_s9 + $0x110] sm:$0xff] }
 0x10c   : > { %v2035_v57 = vpop.eup %2034  ;;  %1658 = vst [vmem:[%s2784_s17 + $0xe0] sm:$0xff] %v1590_v1  ;;  %v969_v47 = vmul.f32 -0.5, %v3420_v10  ;;  %v444_v0 = vand.u32 2147483647, %v3445_v9  ;;  %vm3477_vm15 = vcmp.lt.f32.partialorder %v963_v3, 0.0004427343  ;;  %v1524_v45 = vsub.f32 %v1388_v2, %v1456_v4 }
 0x10d   : > { %v947_v15 = vsel %vm3448_vm13, %v944_v28, %v941_v23  ;;  %v2037_v62 = vpop.eup %2036  ;;  %v950_v42 = vmul.f32 0.6931472, %v2035_v57  ;;  %v616_v11 = vmul.f32 1.442695, %v511_v38  ;;  %v1525_v26 = vsub.f32 %v1389_v20, %v1457_v36  ;;  %v3530_v3 = vld [vmem:[%s2547_s28 + $0x148] sm:$0xff] }
 0x10e   : > { %v1319_v24 = vadd.f32 %v947_v15, %v367_v19  ;;  %v3481_v31 = vpop.eup %2038  ;;  %v959_v40 = vmul.f32 0.6931472, %v2037_v62  ;;  %v512_v46 = vsub.f32 0.0, %v444_v0  ;;  %v3489_v19 = vld [vmem:[%s2555_s9 + $0x100] sm:$0xff]  ;;  %v978_v41 = vmul.f32 -0.5, %v3437_v30  ;;  %v3557_v62 = vld [vmem:[%s2547_s28 + $0x150] sm:$0xff] }
 0x10f   : > { %v956_v51 = vsel %vm3462_vm14, %v953_v12, %v950_v42  ;;  %v984_v43 = vadd.f32 1.0, %v3481_v31  ;;  %v970_v60 = vadd.f32 1.0, %v969_v47  ;;  %2048 = vpow2.f32 %v616_v11  ;;  %v3611_v38 = vld [vmem:[%s2595_s22 + $0x128] sm:$0xff] }
 0x110   : > { %v1591_v27 = vmul.f32 %v1523_v29, %v1319_v24  ;;  %v1320_v25 = vadd.f32 %v956_v51, %v368_v61  ;;  %v965_v44 = vsel %vm3477_vm15, %v962_v48, %v959_v40  ;;  %v972_v37 = vand.u32 2147483647, %v3420_v10 }
 0x111   : > { %v3498_v34 = vpop.eup %2040  ;;  %v1321_v29 = vadd.f32 %v965_v44, %v369_v58  ;;  %2050 = vlog2.f32 %v984_v43  ;;  %v618_v59 = vmul.f32 1.442695, %v512_v46  ;;  %v370_v28 = vmax.f32 %v3252_v49, 0.0  ;;  %v3523_v49 = vld [vmem:[%s2595_s22 + $0x110] sm:$0xff] }
 0x112   : > { %1659 = vst [vmem:[%s2784_s17 + $0xe8] sm:$0xff] %v1591_v27  ;;  %v1592_v50 = vmul.f32 %v1524_v45, %v1320_v25  ;;  %v1526_v52 = vsub.f32 %v3489_v19, %v3492_v7  ;;  %v993_v18 = vadd.f32 1.0, %v3498_v34  ;;  %v979_v35 = vadd.f32 1.0, %v978_v41  ;;  %v3568_v41 = vld [vmem:[%s2555_s9 + $0x118] sm:$0xff] }
 0x113   : > { %v1593_v54 = vmul.f32 %v1525_v26, %v1321_v29  ;;  %v981_v39 = vand.u32 2147483647, %v3437_v30  ;;  %2052 = vpow2.f32 %v618_v59  ;;  %v971_v13 = vmul.f32 %v3420_v10, %v970_v60  ;;  %v3562_v26 = vld [vmem:[%s2547_s28 + $0x158] sm:$0xff] }
 0x114   : > { %1660 = vst [vmem:[%s2784_s17 + $0xf0] sm:$0xff] %v1592_v50  ;;  %v987_v22 = vmul.f32 -0.5, %v3481_v31  ;;  %2054 = vlog2.f32 %v993_v18  ;;  %v445_v61 = vand.u32 2147483647, %v3503_v8  ;;  %vm3533_vm0 = vcmp.lt.f32.partialorder %v972_v37, 0.0004427343 }
 0x115   : > { %v2043_v55 = vpop.eup %2042  ;;  %1661 = vst [vmem:[%s2784_s17 + $0xf8] sm:$0xff] %v1593_v54  ;;  %v371_v23 = vmax.f32 %v3301_v53, 0.0  ;;  %v1527_v2 = vsub.f32 %v3509_v17, %v3512_v21  ;;  %v446_v10 = vand.u32 2147483647, %v3516_v5  ;;  %v372_v12 = vmax.f32 %v3330_v56, 0.0  ;;  %v1461_v60 = vld [vmem:[%s2595_s22 + $0x118] sm:$0xff] }
 0x116   : > { %v968_v58 = vmul.f32 0.6931472, %v2043_v55  ;;  %v1528_v14 = vsub.f32 %v3520_v63, %v3523_v49  ;;  %v513_v4 = vsub.f32 0.0, %v445_v61  ;;  %v980_v36 = vmul.f32 %v3437_v30, %v979_v35  ;;  %v3583_v17 = vld [vmem:[%s2555_s9 + $0x120] sm:$0xff] }
 0x117   : > { %v3544_v20 = vpop.eup %2044  ;;  %vm3547_vm1 = vcmp.lt.f32.partialorder %v981_v39, 0.0004427343  ;;  %v514_v53 = vsub.f32 0.0, %v446_v10  ;;  %v447_v57 = vand.u32 2147483647, %v3530_v3  ;;  %v988_v48 = vadd.f32 1.0, %v987_v22 }
 0x118   : > { %v2047_v15 = vpop.eup %2046  ;;  %v974_v56 = vsel %vm3533_vm0, %v971_v13, %v968_v58  ;;  %v996_v47 = vmul.f32 -0.5, %v3498_v34  ;;  %v1002_v0 = vadd.f32 1.0, %v3544_v20  ;;  %v620_v42 = vmul.f32 1.442695, %v513_v4  ;;  %v3586_v21 = vld [vmem:[%s2595_s22 + $0x120] sm:$0xff] }
 0x119   : > { %v1322_v30 = vadd.f32 %v974_v56, %v370_v28  ;;  %v977_v24 = vmul.f32 0.6931472, %v2047_v15  ;;  %v622_v16 = vmul.f32 1.442695, %v514_v53  ;;  %v990_v11 = vand.u32 2147483647, %v3481_v31 }
 0x11a   : > { %v373_v45 = vmax.f32 %v3351_v33, 0.0  ;;  %2056 = vlog2.f32 %v1002_v0  ;;  %v515_v40 = vsub.f32 0.0, %v447_v57  ;;  %v448_v51 = vand.u32 2147483647, %v3557_v62  ;;  %v3614_v53 = vld [vmem:[%s2555_s9 + $0x130] sm:$0xff]  ;;  %v3638_v49 = vld [vmem:[%s2555_s9 + $0x140] sm:$0xff] }
 0x11b   : > { %v1594_v46 = vmul.f32 %v1526_v52, %v1322_v30  ;;  %v983_v27 = vsel %vm3547_vm1, %v980_v36, %v977_v24  ;;  %2058 = vpow2.f32 %v620_v42  ;;  %v997_v7 = vadd.f32 1.0, %v996_v47  ;;  %v3608_v36 = vld [vmem:[%s2555_s9 + $0x128] sm:$0xff]  ;;  %v3619_v56 = vld [vmem:[%s2595_s22 + $0x130] sm:$0xff]  ;;  %v3628_v30 = vld [vmem:[%s2555_s9 + $0x138] sm:$0xff] }
 0x11c   : > { %v1323_v19 = vadd.f32 %v983_v27, %v371_v23  ;;  %2060 = vpow2.f32 %v622_v16  ;;  %v624_v33 = vmul.f32 1.442695, %v515_v40  ;;  %v3570_v43 = vpop.eup %2048  ;;  %v989_v25 = vmul.f32 %v3481_v31, %v988_v48  ;;  %v3631_v24 = vld [vmem:[%s2595_s22 + $0x138] sm:$0xff]  ;;  %v3670_v28 = vld [vmem:[%s2595_s22 + $0x148] sm:$0xff] }
 0x11d   : > { %1662 = vst [vmem:[%s2784_s17 + $0x100] sm:$0xff] %v1594_v46  ;;  %v999_v44 = vand.u32 2147483647, %v3498_v34  ;;  %v516_v29 = vsub.f32 0.0, %v448_v51  ;;  %v449_v37 = vand.u32 2147483647, %v3562_v26  ;;  %v998_v13 = vmul.f32 %v3498_v34, %v997_v7 }
 0x11e   : > { %v2051_v59 = vpop.eup %2050  ;;  %v1595_v50 = vmul.f32 %v1527_v2, %v1323_v19  ;;  %vm3577_vm2 = vcmp.lt.f32.partialorder %v990_v11, 0.0004427343  ;;  %v1005_v52 = vmul.f32 -0.5, %v3544_v20  ;;  %v1011_v31 = vadd.f32 1.0, %v3570_v43  ;;  %v3605_v34 = vld [vmem:[%s2547_s28 + $0x160] sm:$0xff] }
 0x11f   : > { %v986_v18 = vmul.f32 0.6931472, %v2051_v59  ;;  %2062 = vpow2.f32 %v624_v33  ;;  %v626_v54 = vmul.f32 1.442695, %v516_v29  ;;  %v517_v35 = vsub.f32 0.0, %v449_v37  ;;  %v3656_v33 = vld [vmem:[%s2547_s28 + $0x168] sm:$0xff] }
 0x120   : > { %v3589_v39 = vpop.eup %2052  ;;  %1663 = vst [vmem:[%s2784_s17 + $0x108] sm:$0xff] %v1595_v50  ;;  %v1529_v22 = vsub.f32 %v3568_v41, %v1461_v60  ;;  %v374_v61 = vmax.f32 %v3398_v6, 0.0  ;;  %2064 = vlog2.f32 %v1011_v31  ;;  %vm3597_vm3 = vcmp.lt.f32.partialorder %v999_v44, 0.0004427343  ;;  %v3667_v50 = vld [vmem:[%s2555_s9 + $0x148] sm:$0xff] }
 0x121   : > { %v2055_v55 = vpop.eup %2054  ;;  %v992_v1 = vsel %vm3577_vm2, %v989_v25, %v986_v18  ;;  %v1530_v2 = vsub.f32 %v3583_v17, %v3586_v21  ;;  %v1020_v10 = vadd.f32 1.0, %v3589_v39  ;;  %v1006_v4 = vadd.f32 1.0, %v1005_v52  ;;  %v3659_v25 = vld [vmem:[%s2547_s28 + $0x170] sm:$0xff] }
 0x122   : > { %v1324_v58 = vadd.f32 %v992_v1, %v372_v12  ;;  %v995_v6 = vmul.f32 0.6931472, %v2055_v55  ;;  %2066 = vpow2.f32 %v626_v54  ;;  %v1008_v57 = vand.u32 2147483647, %v3544_v20 }
 0x123   : > { %v375_v15 = vmax.f32 %v3418_v32, 0.0  ;;  %2068 = vlog2.f32 %v1020_v10  ;;  %v628_v12 = vmul.f32 1.442695, %v517_v35  ;;  %v1014_v0 = vmul.f32 -0.5, %v3570_v43 }
 0x124   : > { %v1596_v48 = vmul.f32 %v1528_v14, %v1324_v58  ;;  %v1001_v47 = vsel %vm3597_vm3, %v998_v13, %v995_v6  ;;  %v450_v42 = vand.u32 2147483647, %v3605_v34  ;;  %v1531_v11 = vsub.f32 %v3608_v36, %v3611_v38  ;;  %v3641_v14 = vld [vmem:[%s2595_s22 + $0x140] sm:$0xff] }
 0x125   : > { %v1325_v16 = vadd.f32 %v1001_v47, %v373_v45  ;;  %v376_v63 = vmax.f32 %v3445_v9, 0.0  ;;  %2070 = vpow2.f32 %v628_v12  ;;  %v1007_v40 = vmul.f32 %v3544_v20, %v1006_v4 }
 0x126   : > { %1664 = vst [vmem:[%s2784_s17 + $0x110] sm:$0xff] %v1596_v48  ;;  %v1532_v46 = vsub.f32 %v3614_v53, %v3619_v56  ;;  %v377_v45 = vmax.f32 %v3503_v8, 0.0  ;;  %v518_v27 = vsub.f32 0.0, %v450_v42  ;;  %vm3648_vm4 = vcmp.lt.f32.partialorder %v1008_v57, 0.0004427343  ;;  %v3691_v48 = vld [vmem:[%s2547_s28 + $0x178] sm:$0xff] }
 0x127   : > { %v2057_v51 = vpop.eup %2056  ;;  %v1597_v19 = vmul.f32 %v1529_v22, %v1325_v16  ;;  %v1023_v41 = vmul.f32 -0.5, %v3589_v39  ;;  %v1533_v20 = vsub.f32 %v3628_v30, %v3631_v24  ;;  %v1015_v29 = vadd.f32 1.0, %v1014_v0  ;;  %v3806_v30 = vld [vmem:[%s2555_s9 + $0x160] sm:$0xff]  ;;  %v3826_v53 = vld [vmem:[%s2555_s9 + $0x168] sm:$0xff] }
 0x128   : > { %v3661_v44 = vpop.eup %2058  ;;  %v1004_v60 = vmul.f32 0.6931472, %v2057_v51  ;;  %v378_v37 = vmax.f32 %v3516_v5, 0.0  ;;  %v1534_v59 = vsub.f32 %v3638_v49, %v3641_v14  ;;  %v1017_v31 = vand.u32 2147483647, %v3570_v43  ;;  %v3809_v24 = vld [vmem:[%s2595_s22 + $0x160] sm:$0xff] }
 0x129   : > { %v3672_v52 = vpop.eup %2060  ;;  %1665 = vst [vmem:[%s2784_s17 + $0x118] sm:$0xff] %v1597_v19  ;;  %v1026_v18 = vand.u32 2147483647, %v3589_v39  ;;  %v1029_v54 = vadd.f32 1.0, %v3661_v44  ;;  %v379_v35 = vmax.f32 %v3530_v3, 0.0  ;;  %v1024_v10 = vadd.f32 1.0, %v1023_v41 }
 0x12a   : > { %v1010_v13 = vsel %vm3648_vm4, %v1007_v40, %v1004_v60  ;;  %v1038_v22 = vadd.f32 1.0, %v3672_v52  ;;  %v630_v55 = vmul.f32 1.442695, %v518_v27  ;;  %v451_v1 = vand.u32 2147483647, %v3656_v33 }
 0x12b   : > { %v1326_v23 = vadd.f32 %v1010_v13, %v374_v61  ;;  %2072 = vlog2.f32 %v1029_v54  ;;  %v452_v58 = vand.u32 2147483647, %v3659_v25  ;;  %v1016_v4 = vmul.f32 %v3570_v43, %v1015_v29 }
 0x12c   : > { %v3684_v6 = vpop.eup %2062  ;;  %2074 = vlog2.f32 %v1038_v22  ;;  %v1535_v57 = vsub.f32 %v3667_v50, %v3670_v28  ;;  %v380_v12 = vmax.f32 %v3557_v62, 0.0  ;;  %vm3696_vm5 = vcmp.lt.f32.partialorder %v1017_v31, 0.0004427343  ;;  %v3717_v31 = vld [vmem:[%s2555_s9 + $0x150] sm:$0xff] }
 0x12d   : > { %v2065_v47 = vpop.eup %2064  ;;  %v1598_v61 = vmul.f32 %v1530_v2, %v1326_v23  ;;  %v1032_v42 = vmul.f32 -0.5, %v3661_v44  ;;  %v1047_v43 = vadd.f32 1.0, %v3684_v6  ;;  %vm3702_vm6 = vcmp.lt.f32.partialorder %v1026_v18, 0.0004427343  ;;  %v3723_v22 = vld [vmem:[%s2595_s22 + $0x150] sm:$0xff] }
 0x12e   : > { %v1013_v16 = vmul.f32 0.6931472, %v2065_v47  ;;  %2076 = vpow2.f32 %v630_v55  ;;  %v519_v27 = vsub.f32 0.0, %v451_v1  ;;  %v1025_v17 = vmul.f32 %v3589_v39, %v1024_v10 }
 0x12f   : > { %v3706_v51 = vpop.eup %2066  ;;  %1666 = vst [vmem:[%s2784_s17 + $0x120] sm:$0xff] %v1598_v61  ;;  %2078 = vlog2.f32 %v1047_v43  ;;  %v520_v21 = vsub.f32 0.0, %v452_v58  ;;  %v453_v2 = vand.u32 2147483647, %v3691_v48  ;;  %v1035_v41 = vand.u32 2147483647, %v3661_v44 }
 0x130   : > { %v2069_v19 = vpop.eup %2068  ;;  %v1019_v7 = vsel %vm3696_vm5, %v1016_v4, %v1013_v16  ;;  %v1041_v60 = vmul.f32 -0.5, %v3672_v52  ;;  %v1056_v29 = vadd.f32 1.0, %v3706_v51  ;;  %v1033_v54 = vadd.f32 1.0, %v1032_v42  ;;  %v3729_v58 = vld [vmem:[%s2547_s28 + $0x180] sm:$0xff]  ;;  %v3743_v16 = vld [vmem:[%s2547_s28 + $0x188] sm:$0xff] }
 0x131   : > { %v1327_v39 = vadd.f32 %v1019_v7, %v375_v15  ;;  %v1022_v18 = vmul.f32 0.6931472, %v2069_v19  ;;  %v1044_v13 = vand.u32 2147483647, %v3672_v52  ;;  %v1050_v1 = vmul.f32 -0.5, %v3684_v6 }
 0x132   : > { %v3725_v55 = vpop.eup %2070  ;;  %2080 = vlog2.f32 %v1056_v29  ;;  %v632_v23 = vmul.f32 1.442695, %v519_v27  ;;  %v521_v10 = vsub.f32 0.0, %v453_v2  ;;  %v634_v47 = vmul.f32 1.442695, %v520_v21  ;;  %v3761_v2 = vld [vmem:[%s2547_s28 + $0x190] sm:$0xff] }
 0x133   : > { %v1599_v32 = vmul.f32 %v1531_v11, %v1327_v39  ;;  %v1028_v15 = vsel %vm3702_vm6, %v1025_v17, %v1022_v18  ;;  %v1065_v4 = vadd.f32 1.0, %v3725_v55  ;;  %v1042_v0 = vadd.f32 1.0, %v1041_v60 }
 0x134   : > { %v1328_v61 = vadd.f32 %v1028_v15, %v376_v63  ;;  %v1053_v42 = vand.u32 2147483647, %v3684_v6  ;;  %v1536_v43 = vsub.f32 %v3717_v31, %v3723_v22  ;;  %vm3746_vm7 = vcmp.lt.f32.partialorder %v1035_v41, 0.0004427343  ;;  %v3875_v22 = vld [vmem:[%s2555_s9 + $0x178] sm:$0xff] }
 0x135   : > { %1667 = vst [vmem:[%s2784_s17 + $0x128] sm:$0xff] %v1599_v32  ;;  %2082 = vlog2.f32 %v1065_v4  ;;  %v636_v38 = vmul.f32 1.442695, %v521_v10  ;;  %v454_v9 = vand.u32 2147483647, %v3729_v58  ;;  %v1059_v40 = vmul.f32 -0.5, %v3706_v51 }
 0x136   : > { %v1600_v11 = vmul.f32 %v1532_v46, %v1328_v61  ;;  %vm3754_vm8 = vcmp.lt.f32.partialorder %v1044_v13, 0.0004427343  ;;  %2084 = vpow2.f32 %v632_v23  ;;  %v1034_v27 = vmul.f32 %v3661_v44, %v1033_v54 }
 0x137   : > { %v1051_v17 = vadd.f32 1.0, %v1050_v1  ;;  %2086 = vpow2.f32 %v634_v47  ;;  %v522_v21 = vsub.f32 0.0, %v454_v9  ;;  %v1043_v7 = vmul.f32 %v3672_v52, %v1042_v0  ;;  %v1401_v9 = vld [vmem:[%s2555_s9 + $0x158] sm:$0xff] }
 0x138   : > { %v2073_v19 = vpop.eup %2072  ;;  %1668 = vst [vmem:[%s2784_s17 + $0x130] sm:$0xff] %v1600_v11  ;;  %vm3765_vm9 = vcmp.lt.f32.partialorder %v1053_v42, 0.0004427343  ;;  %2088 = vpow2.f32 %v636_v38  ;;  %v455_v56 = vand.u32 2147483647, %v3743_v16  ;;  %v381_v44 = vmax.f32 %v3562_v26, 0.0 }
 0x139   : > { %v2075_v46 = vpop.eup %2074  ;;  %v1031_v41 = vmul.f32 0.6931472, %v2073_v19  ;;  %v1068_v60 = vmul.f32 -0.5, %v3725_v55  ;;  %v638_v29 = vmul.f32 1.442695, %v522_v21  ;;  %v1060_v18 = vadd.f32 1.0, %v1059_v40 }
 0x13a   : > { %v1040_v39 = vmul.f32 0.6931472, %v2075_v46  ;;  %v523_v54 = vsub.f32 0.0, %v455_v56  ;;  %v456_v52 = vand.u32 2147483647, %v3761_v2  ;;  %v1052_v23 = vmul.f32 %v3684_v6, %v1051_v17  ;;  %v3788_v38 = vld [vmem:[%s2547_s28 + $0x198] sm:$0xff] }
 0x13b   : > { %v3773_v13 = vpop.eup %2076  ;;  %v1037_v1 = vsel %vm3746_vm7, %v1034_v27, %v1031_v41  ;;  %v1062_v10 = vand.u32 2147483647, %v3706_v51  ;;  %2090 = vpow2.f32 %v638_v29  ;;  %v1071_v47 = vand.u32 2147483647, %v3725_v55  ;;  %v1469_v11 = vld [vmem:[%s2595_s22 + $0x158] sm:$0xff]  ;;  %v3829_v56 = vld [vmem:[%s2595_s22 + $0x168] sm:$0xff] }
 0x13c   : > { %v2079_v32 = vpop.eup %2078  ;;  %v1329_v15 = vadd.f32 %v1037_v1, %v377_v45  ;;  %v1046_v4 = vsel %vm3754_vm8, %v1043_v7, %v1040_v39  ;;  %v1074_v61 = vadd.f32 1.0, %v3773_v13  ;;  %v1069_v42 = vadd.f32 1.0, %v1068_v60 }
 0x13d   : > { %v1330_v0 = vadd.f32 %v1046_v4, %v378_v37  ;;  %v1049_v6 = vmul.f32 0.6931472, %v2079_v32  ;;  %v640_v36 = vmul.f32 1.442695, %v523_v54  ;;  %v1061_v45 = vmul.f32 %v3706_v51, %v1060_v18  ;;  %v3852_v54 = vld [vmem:[%s2547_s28 + $0x1a8] sm:$0xff]  ;;  %v3867_v4 = vld [vmem:[%s2595_s22 + $0x170] sm:$0xff] }
 0x13e   : > { %v1601_v8 = vmul.f32 %v1533_v20, %v1329_v15  ;;  %2092 = vlog2.f32 %v1074_v61  ;;  %v524_v5 = vsub.f32 0.0, %v456_v52  ;;  %vm3801_vm10 = vcmp.lt.f32.partialorder %v1062_v10, 0.0004427343  ;;  %v3812_v20 = vld [vmem:[%s2547_s28 + $0x1a0] sm:$0xff]  ;;  %v3864_v15 = vld [vmem:[%s2555_s9 + $0x170] sm:$0xff] }
 0x13f   : > { %v2081_v37 = vpop.eup %2080  ;;  %v1602_v63 = vmul.f32 %v1534_v59, %v1330_v0  ;;  %v1055_v40 = vsel %vm3765_vm9, %v1052_v23, %v1049_v6  ;;  %2094 = vpow2.f32 %v640_v36  ;;  %v457_v51 = vand.u32 2147483647, %v3788_v38 }
 0x140   : > { %1669 = vst [vmem:[%s2784_s17 + $0x138] sm:$0xff] %v1601_v8  ;;  %v1331_v49 = vadd.f32 %v1055_v40, %v379_v35  ;;  %v1058_v14 = vmul.f32 0.6931472, %v2081_v37  ;;  %v642_v59 = vmul.f32 1.442695, %v524_v5  ;;  %v1070_v17 = vmul.f32 %v3725_v55, %v1069_v42  ;;  %v3890_v37 = vld [vmem:[%s2555_s9 + $0x180] sm:$0xff] }
 0x141   : > { %1670 = vst [vmem:[%s2784_s17 + $0x140] sm:$0xff] %v1602_v63  ;;  %vm3820_vm11 = vcmp.lt.f32.partialorder %v1071_v47, 0.0004427343  ;;  %v1537_v19 = vsub.f32 %v1401_v9, %v1469_v11  ;;  %v382_v7 = vmax.f32 %v3605_v34, 0.0  ;;  %v1077_v46 = vmul.f32 -0.5, %v3773_v13  ;;  %v3893_v63 = vld [vmem:[%s2595_s22 + $0x180] sm:$0xff] }
 0x142   : > { %v2083_v3 = vpop.eup %2082  ;;  %v1603_v35 = vmul.f32 %v1535_v57, %v1331_v49  ;;  %v1064_v55 = vsel %vm3801_vm10, %v1061_v45, %v1058_v14  ;;  %2096 = vpow2.f32 %v642_v59  ;;  %v1538_v39 = vsub.f32 %v3806_v30, %v3809_v24  ;;  %v3944_v30 = vld [vmem:[%s2547_s28 + $0x1c0] sm:$0xff] }
 0x143   : > { %v3837_v41 = vpop.eup %2084  ;;  %v1332_v60 = vadd.f32 %v1064_v55, %v380_v12  ;;  %v1067_v29 = vmul.f32 0.6931472, %v2083_v3  ;;  %v458_v50 = vand.u32 2147483647, %v3812_v20  ;;  %v383_v57 = vmax.f32 %v3656_v33, 0.0 }
 0x144   : > { %v3844_v28 = vpop.eup %2086  ;;  %1671 = vst [vmem:[%s2784_s17 + $0x148] sm:$0xff] %v1603_v35  ;;  %v1083_v18 = vadd.f32 1.0, %v3837_v41  ;;  %v1539_v62 = vsub.f32 %v3826_v53, %v3829_v56  ;;  %v525_v12 = vsub.f32 0.0, %v457_v51  ;;  %v384_v10 = vmax.f32 %v3659_v25, 0.0 }
 0x145   : > { %v3854_v52 = vpop.eup %2088  ;;  %v1604_v1 = vmul.f32 %v1536_v43, %v1332_v60  ;;  %v1073_v23 = vsel %vm3820_vm11, %v1070_v17, %v1067_v29  ;;  %v1092_v32 = vadd.f32 1.0, %v3844_v28  ;;  %v1078_v61 = vadd.f32 1.0, %v1077_v46  ;;  %v3878_v43 = vld [vmem:[%s2595_s22 + $0x178] sm:$0xff] }
 0x146   : > { %v1333_v47 = vadd.f32 %v1073_v23, %v381_v44  ;;  %v1080_v0 = vand.u32 2147483647, %v3773_v13  ;;  %2098 = vlog2.f32 %v1083_v18  ;;  %v1101_v31 = vadd.f32 1.0, %v3854_v52 }
 0x147   : > { %1672 = vst [vmem:[%s2784_s17 + $0x150] sm:$0xff] %v1604_v1  ;;  %2100 = vlog2.f32 %v1092_v32  ;;  %v526_v6 = vsub.f32 0.0, %v458_v50  ;;  %v459_v42 = vand.u32 2147483647, %v3852_v54  ;;  %v1540_v36 = vsub.f32 %v3864_v15, %v3867_v4  ;;  %v3916_v1 = vld [vmem:[%s2547_s28 + $0x1b0] sm:$0xff] }
 0x148   : > { %v3881_v26 = vpop.eup %2090  ;;  %v1605_v44 = vmul.f32 %v1537_v19, %v1333_v47  ;;  %v385_v8 = vmax.f32 %v3691_v48, 0.0  ;;  %v644_v45 = vmul.f32 1.442695, %v525_v12  ;;  %v1086_v9 = vmul.f32 -0.5, %v3837_v41 }
 0x149   : > { %v1095_v11 = vmul.f32 -0.5, %v3844_v28  ;;  %2102 = vlog2.f32 %v1101_v31  ;;  %v1110_v5 = vadd.f32 1.0, %v3881_v26  ;;  %v1079_v40 = vmul.f32 %v3773_v13, %v1078_v61 }
 0x14a   : > { %1673 = vst [vmem:[%s2784_s17 + $0x158] sm:$0xff] %v1605_v44  ;;  %vm3897_vm12 = vcmp.lt.f32.partialorder %v1080_v0, 0.0004427343  ;;  %v1541_v49 = vsub.f32 %v3875_v22, %v3878_v43  ;;  %v386_v14 = vmax.f32 %v3729_v58, 0.0  ;;  %v1104_v51 = vmul.f32 -0.5, %v3854_v52  ;;  %v1408_v43 = vld [vmem:[%s2555_s9 + $0x190] sm:$0xff] }
 0x14b   : > { %v2093_v59 = vpop.eup %2092  ;;  %2104 = vlog2.f32 %v1110_v5  ;;  %v646_v17 = vmul.f32 1.442695, %v526_v6  ;;  %v527_v21 = vsub.f32 0.0, %v459_v42  ;;  %v1089_v13 = vand.u32 2147483647, %v3837_v41  ;;  %v3926_v42 = vld [vmem:[%s2547_s28 + $0x1b8] sm:$0xff] }
 0x14c   : > { %v3905_v19 = vpop.eup %2094  ;;  %v1076_v3 = vmul.f32 0.6931472, %v2093_v59  ;;  %v1113_v35 = vmul.f32 -0.5, %v3881_v26  ;;  %v1542_v55 = vsub.f32 %v3890_v37, %v3893_v63  ;;  %v1087_v46 = vadd.f32 1.0, %v1086_v9  ;;  %v3954_v59 = vld [vmem:[%s2547_s28 + $0x1c8] sm:$0xff]  ;;  %v4025_v63 = vld [vmem:[%s2547_s28 + $0x1d0] sm:$0xff] }
 0x14d   : > { %v1096_v60 = vadd.f32 1.0, %v1095_v11  ;;  %v1119_v29 = vadd.f32 1.0, %v3905_v19  ;;  %2106 = vpow2.f32 %v644_v45  ;;  %v1098_v18 = vand.u32 2147483647, %v3844_v28  ;;  %v1407_v11 = vld [vmem:[%s2555_s9 + $0x188] sm:$0xff] }
 0x14e   : > { %v1082_v50 = vsel %vm3897_vm12, %v1079_v40, %v1076_v3  ;;  %2108 = vpow2.f32 %v646_v17  ;;  %v648_v12 = vmul.f32 1.442695, %v527_v21  ;;  %v1105_v47 = vadd.f32 1.0, %v1104_v51 }
 0x14f   : > { %v3918_v23 = vpop.eup %2096  ;;  %v1334_v32 = vadd.f32 %v1082_v50, %v382_v7  ;;  %v1107_v61 = vand.u32 2147483647, %v3854_v52  ;;  %2110 = vlog2.f32 %v1119_v29  ;;  %v1114_v0 = vadd.f32 1.0, %v1113_v35 }
 0x150   : > { %v1116_v31 = vand.u32 2147483647, %v3881_v26  ;;  %v1128_v6 = vadd.f32 1.0, %v3918_v23  ;;  %2112 = vpow2.f32 %v648_v12  ;;  %vm3931_vm13 = vcmp.lt.f32.partialorder %v1089_v13, 0.0004427343 }
 0x151   : > { %v1606_v34 = vmul.f32 %v1538_v39, %v1334_v32  ;;  %v387_v44 = vmax.f32 %v3743_v16, 0.0  ;;  %v460_v45 = vand.u32 2147483647, %v3916_v1  ;;  %v1088_v9 = vmul.f32 %v3837_v41, %v1087_v46 }
 0x152   : > { %vm3938_vm14 = vcmp.lt.f32.partialorder %v1098_v18, 0.0004427343  ;;  %v1122_v5 = vmul.f32 -0.5, %v3905_v19  ;;  %2114 = vlog2.f32 %v1128_v6  ;;  %v1097_v39 = vmul.f32 %v3844_v28, %v1096_v60 }
 0x153   : > { %v2099_v24 = vpop.eup %2098  ;;  %1674 = vst [vmem:[%s2784_s17 + $0x160] sm:$0xff] %v1606_v34  ;;  %vm3948_vm15 = vcmp.lt.f32.partialorder %v1107_v61, 0.0004427343  ;;  %v528_v27 = vsub.f32 0.0, %v460_v45  ;;  %v461_v41 = vand.u32 2147483647, %v3926_v42  ;;  %v1106_v21 = vmul.f32 %v3854_v52, %v1105_v47 }
 0x154   : > { %v2101_v51 = vpop.eup %2100  ;;  %v1085_v17 = vmul.f32 0.6931472, %v2099_v24  ;;  %v1115_v3 = vmul.f32 %v3881_v26, %v1114_v0  ;;  %vm3958_vm0 = vcmp.lt.f32.partialorder %v1116_v31, 0.0004427343  ;;  %v1131_v35 = vmul.f32 -0.5, %v3918_v23 }
 0x155   : > { %v1094_v28 = vmul.f32 0.6931472, %v2101_v51  ;;  %v650_v46 = vmul.f32 1.442695, %v528_v27  ;;  %v529_v60 = vsub.f32 0.0, %v461_v41  ;;  %v1123_v18 = vadd.f32 1.0, %v1122_v5 }
 0x156   : > { %v2103_v29 = vpop.eup %2102  ;;  %v1091_v50 = vsel %vm3931_vm13, %v1088_v9, %v1085_v17  ;;  %v462_v12 = vand.u32 2147483647, %v3944_v30  ;;  %v463_v52 = vand.u32 2147483647, %v3954_v59  ;;  %v1125_v31 = vand.u32 2147483647, %v3905_v19 }
 0x157   : > { %v1335_v26 = vadd.f32 %v1091_v50, %v383_v57  ;;  %v1100_v32 = vsel %vm3938_vm14, %v1097_v39, %v1094_v28  ;;  %v1103_v47 = vmul.f32 0.6931472, %v2103_v29  ;;  %2116 = vpow2.f32 %v650_v46  ;;  %v1475_v5 = vld [vmem:[%s2595_s22 + $0x188] sm:$0xff]  ;;  %v4033_v46 = vld [vmem:[%s2547_s28 + $0x1d8] sm:$0xff] }
 0x158   : > { %v2105_v61 = vpop.eup %2104  ;;  %v1336_v0 = vadd.f32 %v1100_v32, %v384_v10  ;;  %v1134_v6 = vand.u32 2147483647, %v3918_v23  ;;  %v652_v34 = vmul.f32 1.442695, %v529_v60  ;;  %v1132_v45 = vadd.f32 1.0, %v1131_v35  ;;  %v4038_v50 = vld [vmem:[%s2555_s9 + $0x198] sm:$0xff] }
 0x159   : > { %v1607_v33 = vmul.f32 %v1539_v62, %v1335_v26  ;;  %v1109_v57 = vsel %vm3948_vm15, %v1106_v21, %v1103_v47  ;;  %v1112_v7 = vmul.f32 0.6931472, %v2105_v61  ;;  %v530_v53 = vsub.f32 0.0, %v462_v12  ;;  %v4049_v26 = vld [vmem:[%s2555_s9 + $0x1a0] sm:$0xff] }
 0x15a   : > { %v3980_v9 = vpop.eup %2106  ;;  %v1608_v25 = vmul.f32 %v1540_v36, %v1336_v0  ;;  %v1337_v10 = vadd.f32 %v1109_v57, %v385_v8  ;;  %2118 = vpow2.f32 %v652_v34  ;;  %v1124_v24 = vmul.f32 %v3905_v19, %v1123_v18  ;;  %v4052_v32 = vld [vmem:[%s2595_s22 + $0x1a0] sm:$0xff]  ;;  %v1479_v8 = vld [vmem:[%s2595_s22 + $0x1a8] sm:$0xff] }
 0x15b   : > { %v3989_v56 = vpop.eup %2108  ;;  %1675 = vst [vmem:[%s2784_s17 + $0x168] sm:$0xff] %v1607_v33  ;;  %v1118_v62 = vsel %vm3958_vm0, %v1115_v3, %v1112_v7  ;;  %v1137_v39 = vadd.f32 1.0, %v3980_v9  ;;  %v531_v15 = vsub.f32 0.0, %v463_v52  ;;  %vm4002_vm1 = vcmp.lt.f32.partialorder %v1125_v31, 0.0004427343  ;;  %v4046_v52 = vld [vmem:[%s2595_s22 + $0x198] sm:$0xff] }
 0x15c   : > { %v2111_v48 = vpop.eup %2110  ;;  %1676 = vst [vmem:[%s2784_s17 + $0x170] sm:$0xff] %v1608_v25  ;;  %v1609_v4 = vmul.f32 %v1541_v49, %v1337_v10  ;;  %v1338_v36 = vadd.f32 %v1118_v62, %v386_v14  ;;  %v1146_v19 = vadd.f32 1.0, %v3989_v56  ;;  %v1543_v41 = vsub.f32 %v1407_v11, %v1475_v5  ;;  %v1476_v49 = vld [vmem:[%s2595_s22 + $0x190] sm:$0xff] }
 0x15d   : > { %v4007_v40 = vpop.eup %2112  ;;  %v1121_v27 = vmul.f32 0.6931472, %v2111_v48  ;;  %v388_v51 = vmax.f32 %v3761_v2, 0.0  ;;  %2120 = vlog2.f32 %v1137_v39  ;;  %v1133_v22 = vmul.f32 %v3918_v23, %v1132_v45  ;;  %v4077_v48 = vld [vmem:[%s2547_s28 + $0x1e8] sm:$0xff] }
 0x15e   : > { %1677 = vst [vmem:[%s2784_s17 + $0x178] sm:$0xff] %v1609_v4  ;;  %v1610_v58 = vmul.f32 %v1542_v55, %v1338_v36  ;;  %2122 = vlog2.f32 %v1146_v19  ;;  %v654_v14 = vmul.f32 1.442695, %v530_v53  ;;  %vm4019_vm2 = vcmp.lt.f32.partialorder %v1134_v6, 0.0004427343  ;;  %v1411_v36 = vld [vmem:[%s2555_s9 + $0x1a8] sm:$0xff] }
 0x15f   : > { %v2115_v17 = vpop.eup %2114  ;;  %v1127_v21 = vsel %vm4002_vm1, %v1124_v24, %v1121_v27  ;;  %v1155_v3 = vadd.f32 1.0, %v4007_v40  ;;  %v656_v37 = vmul.f32 1.442695, %v531_v15  ;;  %v1544_v13 = vsub.f32 %v1408_v43, %v1476_v49  ;;  %v4090_v43 = vld [vmem:[%s2547_s28 + $0x1f0] sm:$0xff] }
 0x160   : > { %1678 = vst [vmem:[%s2784_s17 + $0x180] sm:$0xff] %v1610_v58  ;;  %v1339_v55 = vadd.f32 %v1127_v21, %v387_v44  ;;  %v1130_v23 = vmul.f32 0.6931472, %v2115_v17  ;;  %v1140_v28 = vmul.f32 -0.5, %v3980_v9  ;;  %v1149_v35 = vmul.f32 -0.5, %v3989_v56  ;;  %v4042_v44 = vld [vmem:[%s2547_s28 + $0x1e0] sm:$0xff] }
 0x161   : > { %2124 = vlog2.f32 %v1155_v3  ;;  %v464_v16 = vand.u32 2147483647, %v4025_v63  ;;  %v389_v12 = vmax.f32 %v3788_v38, 0.0  ;;  %v1143_v61 = vand.u32 2147483647, %v3980_v9 }
 0x162   : > { %v1611_v60 = vmul.f32 %v1543_v41, %v1339_v55  ;;  %v1136_v29 = vsel %vm4019_vm2, %v1133_v22, %v1130_v23  ;;  %2126 = vpow2.f32 %v654_v14  ;;  %v1158_v0 = vmul.f32 -0.5, %v4007_v40 }
 0x163   : > { %v1340_v18 = vadd.f32 %v1136_v29, %v388_v51  ;;  %2128 = vpow2.f32 %v656_v37  ;;  %v532_v31 = vsub.f32 0.0, %v464_v16  ;;  %v465_v6 = vand.u32 2147483647, %v4033_v46 }
 0x164   : > { %v4054_v47 = vpop.eup %2116  ;;  %1679 = vst [vmem:[%s2784_s17 + $0x188] sm:$0xff] %v1611_v60  ;;  %v1141_v38 = vadd.f32 1.0, %v1140_v28  ;;  %v1150_v33 = vadd.f32 1.0, %v1149_v35  ;;  %v1545_v7 = vsub.f32 %v4038_v50, %v4046_v52  ;;  %v1152_v45 = vand.u32 2147483647, %v3989_v56  ;;  %v1480_v52 = vld [vmem:[%s2595_s22 + $0x1b0] sm:$0xff] }
 0x165   : > { %v1612_v34 = vmul.f32 %v1544_v13, %v1340_v18  ;;  %v1164_v57 = vadd.f32 1.0, %v4054_v47  ;;  %v658_v25 = vmul.f32 1.442695, %v532_v31  ;;  %v533_v10 = vsub.f32 0.0, %v465_v6  ;;  %v1412_v18 = vld [vmem:[%s2555_s9 + $0x1b0] sm:$0xff] }
 0x166   : > { %v390_v5 = vmax.f32 %v3812_v20, 0.0  ;;  %v1546_v53 = vsub.f32 %v4049_v26, %v4052_v32  ;;  %v466_v62 = vand.u32 2147483647, %v4042_v44  ;;  %vm4071_vm3 = vcmp.lt.f32.partialorder %v1143_v61, 0.0004427343 }
 0x167   : > { %v4064_v11 = vpop.eup %2118  ;;  %1680 = vst [vmem:[%s2784_s17 + $0x190] sm:$0xff] %v1612_v34  ;;  %2130 = vlog2.f32 %v1164_v57  ;;  %v1159_v39 = vadd.f32 1.0, %v1158_v0  ;;  %v1142_v4 = vmul.f32 %v3980_v9, %v1141_v38  ;;  %v1151_v20 = vmul.f32 %v3989_v56, %v1150_v33  ;;  %v4118_v57 = vld [vmem:[%s2547_s28 + $0x1f8] sm:$0xff] }
 0x168   : > { %v1173_v15 = vadd.f32 1.0, %v4064_v11  ;;  %2132 = vpow2.f32 %v658_v25  ;;  %v660_v19 = vmul.f32 1.442695, %v533_v10  ;;  %v534_v27 = vsub.f32 0.0, %v466_v62  ;;  %v1413_v10 = vld [vmem:[%s2555_s9 + $0x1b8] sm:$0xff] }
 0x169   : > { %vm4083_vm4 = vcmp.lt.f32.partialorder %v1152_v45, 0.0004427343  ;;  %v1161_v58 = vand.u32 2147483647, %v4007_v40  ;;  %v1167_v22 = vmul.f32 -0.5, %v4054_v47  ;;  %v391_v21 = vmax.f32 %v3852_v54, 0.0 }
 0x16a   : > { %v2121_v41 = vpop.eup %2120  ;;  %2134 = vlog2.f32 %v1173_v15  ;;  %v662_v56 = vmul.f32 1.442695, %v534_v27  ;;  %v467_v14 = vand.u32 2147483647, %v4077_v48  ;;  %v1160_v2 = vmul.f32 %v4007_v40, %v1159_v39  ;;  %v4138_v27 = vld [vmem:[%s2595_s22 + $0x1c0] sm:$0xff] }
 0x16b   : > { %v2123_v49 = vpop.eup %2122  ;;  %v1139_v9 = vmul.f32 0.6931472, %v2121_v41  ;;  %2136 = vpow2.f32 %v660_v19  ;;  %v1547_v3 = vsub.f32 %v1411_v36, %v1479_v8  ;;  %v468_v23 = vand.u32 2147483647, %v4090_v43  ;;  %v4135_v19 = vld [vmem:[%s2555_s9 + $0x1c0] sm:$0xff] }
 0x16c   : > { %v1148_v17 = vmul.f32 0.6931472, %v2123_v49  ;;  %2138 = vpow2.f32 %v662_v56  ;;  %v535_v55 = vsub.f32 0.0, %v467_v14  ;;  %vm4100_vm5 = vcmp.lt.f32.partialorder %v1161_v58, 0.0004427343  ;;  %v4145_v49 = vld [vmem:[%s2547_s28 + $0x200] sm:$0xff] }
 0x16d   : > { %v1145_v37 = vsel %vm4071_vm3, %v1142_v4, %v1139_v9  ;;  %v1176_v54 = vmul.f32 -0.5, %v4064_v11  ;;  %v1168_v16 = vadd.f32 1.0, %v1167_v22  ;;  %v1170_v61 = vand.u32 2147483647, %v4054_v47 }
 0x16e   : > { %v2125_v13 = vpop.eup %2124  ;;  %v1341_v28 = vadd.f32 %v1145_v37, %v389_v12  ;;  %v1154_v35 = vsel %vm4083_vm4, %v1151_v20, %v1148_v17  ;;  %v536_v12 = vsub.f32 0.0, %v468_v23  ;;  %v664_v31 = vmul.f32 1.442695, %v535_v55  ;;  %v4160_v37 = vld [vmem:[%s2555_s9 + $0x1c8] sm:$0xff] }
 0x16f   : > { %v4105_v40 = vpop.eup %2126  ;;  %v1342_v29 = vadd.f32 %v1154_v35, %v390_v5  ;;  %v1157_v50 = vmul.f32 0.6931472, %v2125_v13  ;;  %v392_v38 = vmax.f32 %v3916_v1, 0.0  ;;  %v1548_v25 = vsub.f32 %v1412_v18, %v1480_v52  ;;  %v1481_v5 = vld [vmem:[%s2595_s22 + $0x1b8] sm:$0xff]  ;;  %v4163_v55 = vld [vmem:[%s2595_s22 + $0x1c8] sm:$0xff] }
 0x170   : > { %v4109_v26 = vpop.eup %2128  ;;  %v1613_v32 = vmul.f32 %v1545_v7, %v1341_v28  ;;  %v1182_v0 = vadd.f32 1.0, %v4105_v40  ;;  %v1177_v7 = vadd.f32 1.0, %v1176_v54  ;;  %v1179_v62 = vand.u32 2147483647, %v4064_v11 }
 0x171   : > { %v1614_v6 = vmul.f32 %v1546_v53, %v1342_v29  ;;  %v1163_v34 = vsel %vm4100_vm5, %v1160_v2, %v1157_v50  ;;  %v1191_v33 = vadd.f32 1.0, %v4109_v26  ;;  %v1169_v53 = vmul.f32 %v4054_v47, %v1168_v16 }
 0x172   : > { %1681 = vst [vmem:[%s2784_s17 + $0x198] sm:$0xff] %v1613_v32  ;;  %v1343_v45 = vadd.f32 %v1163_v34, %v391_v21  ;;  %2140 = vlog2.f32 %v1182_v0  ;;  %v666_v1 = vmul.f32 1.442695, %v536_v12  ;;  %vm4126_vm6 = vcmp.lt.f32.partialorder %v1170_v61, 0.0004427343  ;;  %v4175_v12 = vld [vmem:[%s2555_s9 + $0x1d0] sm:$0xff] }
 0x173   : > { %1682 = vst [vmem:[%s2784_s17 + $0x1a0] sm:$0xff] %v1614_v6  ;;  %2142 = vlog2.f32 %v1191_v33  ;;  %v469_v4 = vand.u32 2147483647, %v4118_v57  ;;  %v393_v47 = vmax.f32 %v3926_v42, 0.0  ;;  %v1549_v8 = vsub.f32 %v1413_v10, %v1481_v5  ;;  %v4198_v10 = vld [vmem:[%s2547_s28 + $0x210] sm:$0xff] }
 0x174   : > { %v2131_v24 = vpop.eup %2130  ;;  %v1615_v39 = vmul.f32 %v1547_v3, %v1343_v45  ;;  %2144 = vpow2.f32 %v664_v31  ;;  %v1178_v41 = vmul.f32 %v4064_v11, %v1177_v7  ;;  %v1185_v51 = vmul.f32 -0.5, %v4105_v40  ;;  %v4186_v31 = vld [vmem:[%s2547_s28 + $0x208] sm:$0xff] }
 0x175   : > { %v4131_v20 = vpop.eup %2132  ;;  %v1166_v36 = vmul.f32 0.6931472, %v2131_v24  ;;  %2146 = vpow2.f32 %v666_v1  ;;  %v537_v22 = vsub.f32 0.0, %v469_v4  ;;  %vm4149_vm7 = vcmp.lt.f32.partialorder %v1179_v62, 0.0004427343 }
 0x176   : > { %1683 = vst [vmem:[%s2784_s17 + $0x1a8] sm:$0xff] %v1615_v39  ;;  %v1200_v58 = vadd.f32 1.0, %v4131_v20  ;;  %v394_v14 = vmax.f32 %v3944_v30, 0.0  ;;  %v1194_v17 = vmul.f32 -0.5, %v4109_v26  ;;  %v1550_v3 = vsub.f32 %v4135_v19, %v4138_v27 }
 0x177   : > { %v2135_v9 = vpop.eup %2134  ;;  %v1172_v42 = vsel %vm4126_vm6, %v1169_v53, %v1166_v36  ;;  %v1188_v23 = vand.u32 2147483647, %v4105_v40  ;;  %v395_v30 = vmax.f32 %v3954_v59, 0.0  ;;  %v470_v28 = vand.u32 2147483647, %v4145_v49  ;;  %v4178_v59 = vld [vmem:[%s2595_s22 + $0x1d0] sm:$0xff] }
 0x178   : > { %v4155_v11 = vpop.eup %2136  ;;  %v1344_v21 = vadd.f32 %v1172_v42, %v392_v38  ;;  %v1175_v2 = vmul.f32 0.6931472, %v2135_v9  ;;  %2148 = vlog2.f32 %v1200_v58  ;;  %v1186_v29 = vadd.f32 1.0, %v1185_v51  ;;  %v4216_v51 = vld [vmem:[%s2595_s22 + $0x1d8] sm:$0xff]  ;;  %v1486_v53 = vld [vmem:[%s2595_s22 + $0x1e0] sm:$0xff] }
 0x179   : > { %v1209_v13 = vadd.f32 1.0, %v4155_v11  ;;  %v4169_v35 = vpop.eup %2138  ;;  %v668_v50 = vmul.f32 1.442695, %v537_v22  ;;  %v1195_v18 = vadd.f32 1.0, %v1194_v17  ;;  %v1197_v52 = vand.u32 2147483647, %v4109_v26 }
 0x17a   : > { %v1616_v60 = vmul.f32 %v1548_v25, %v1344_v21  ;;  %v1181_v54 = vsel %vm4149_vm7, %v1178_v41, %v1175_v2  ;;  %v1551_v32 = vsub.f32 %v4160_v37, %v4163_v55  ;;  %v1203_v61 = vmul.f32 -0.5, %v4131_v20 }
 0x17b   : > { %v1345_v16 = vadd.f32 %v1181_v54, %v393_v47  ;;  %2150 = vlog2.f32 %v1209_v13  ;;  %v1218_v0 = vadd.f32 1.0, %v4169_v35  ;;  %v396_v34 = vmax.f32 %v4025_v63, 0.0  ;;  %v4232_v13 = vld [vmem:[%s2547_s28 + $0x218] sm:$0xff] }
 0x17c   : > { %1684 = vst [vmem:[%s2784_s17 + $0x1b0] sm:$0xff] %v1616_v60  ;;  %2152 = vpow2.f32 %v668_v50  ;;  %v1212_v38 = vmul.f32 -0.5, %v4155_v11  ;;  %v538_v33 = vsub.f32 0.0, %v470_v28  ;;  %v1187_v45 = vmul.f32 %v4105_v40, %v1186_v29  ;;  %v4207_v40 = vld [vmem:[%s2555_s9 + $0x1d8] sm:$0xff] }
 0x17d   : > { %v1617_v6 = vmul.f32 %v1549_v8, %v1345_v16  ;;  %vm4191_vm8 = vcmp.lt.f32.partialorder %v1188_v23, 0.0004427343  ;;  %v1552_v7 = vsub.f32 %v4175_v12, %v4178_v59  ;;  %2154 = vlog2.f32 %v1218_v0 }
 0x17e   : > { %v1196_v63 = vmul.f32 %v4109_v26, %v1195_v18  ;;  %vm4202_vm9 = vcmp.lt.f32.partialorder %v1197_v52, 0.0004427343  ;;  %v670_v62 = vmul.f32 1.442695, %v538_v33  ;;  %v471_v1 = vand.u32 2147483647, %v4186_v31 }
 0x17f   : > { %v2141_v5 = vpop.eup %2140  ;;  %1685 = vst [vmem:[%s2784_s17 + $0x1b8] sm:$0xff] %v1617_v6  ;;  %v1204_v15 = vadd.f32 1.0, %v1203_v61  ;;  %v1206_v4 = vand.u32 2147483647, %v4131_v20  ;;  %v397_v36 = vmax.f32 %v4033_v46, 0.0  ;;  %v1213_v26 = vadd.f32 1.0, %v1212_v38 }
 0x180   : > { %v2143_v24 = vpop.eup %2142  ;;  %v1184_v39 = vmul.f32 0.6931472, %v2141_v5  ;;  %v1215_v41 = vand.u32 2147483647, %v4155_v11  ;;  %2156 = vpow2.f32 %v670_v62  ;;  %v1221_v9 = vmul.f32 -0.5, %v4169_v35 }
 0x181   : > { %v4212_v47 = vpop.eup %2144  ;;  %v1193_v8 = vmul.f32 0.6931472, %v2143_v24  ;;  %v539_v46 = vsub.f32 0.0, %v471_v1  ;;  %v472_v2 = vand.u32 2147483647, %v4198_v10  ;;  %v1205_v55 = vmul.f32 %v4131_v20, %v1204_v15 }
 0x182   : > { %v4218_v58 = vpop.eup %2146  ;;  %v1190_v22 = vsel %vm4191_vm8, %v1187_v45, %v1184_v39  ;;  %v1227_v42 = vadd.f32 1.0, %v4212_v47  ;;  %v1553_v23 = vsub.f32 %v4207_v40, %v4216_v51  ;;  %vm4237_vm10 = vcmp.lt.f32.partialorder %v1206_v4, 0.0004427343 }
 0x183   : > { %v1346_v56 = vadd.f32 %v1190_v22, %v394_v14  ;;  %v1199_v17 = vsel %vm4202_vm9, %v1196_v63, %v1193_v8  ;;  %v1236_v21 = vadd.f32 1.0, %v4218_v58  ;;  %v1222_v29 = vadd.f32 1.0, %v1221_v9  ;;  %v1418_v63 = vld [vmem:[%s2555_s9 + $0x1e0] sm:$0xff]  ;;  %v1419_v9 = vld [vmem:[%s2555_s9 + $0x1e8] sm:$0xff] }
 0x184   : > { %v1347_v37 = vadd.f32 %v1199_v17, %v395_v30  ;;  %2158 = vlog2.f32 %v1227_v42  ;;  %v1224_v30 = vand.u32 2147483647, %v4169_v35  ;;  %v672_v50 = vmul.f32 1.442695, %v539_v46  ;;  %v1487_v42 = vld [vmem:[%s2595_s22 + $0x1e8] sm:$0xff] }
 0x185   : > { %v2149_v28 = vpop.eup %2148  ;;  %v1618_v14 = vmul.f32 %v1550_v3, %v1346_v56  ;;  %2160 = vlog2.f32 %v1236_v21  ;;  %v1214_v16 = vmul.f32 %v4155_v11, %v1213_v26  ;;  %vm4244_vm11 = vcmp.lt.f32.partialorder %v1215_v41, 0.0004427343 }
 0x186   : > { %v1619_v20 = vmul.f32 %v1551_v32, %v1347_v37  ;;  %v1202_v54 = vmul.f32 0.6931472, %v2149_v28  ;;  %v540_v19 = vsub.f32 0.0, %v472_v2  ;;  %v473_v27 = vand.u32 2147483647, %v4232_v13  ;;  %v1420_v37 = vld [vmem:[%s2555_s9 + $0x1f0] sm:$0xff] }
 0x187   : > { %1686 = vst [vmem:[%s2784_s17 + $0x1c0] sm:$0xff] %v1618_v14  ;;  %v1230_v32 = vmul.f32 -0.5, %v4212_v47  ;;  %v1239_v61 = vmul.f32 -0.5, %v4218_v58  ;;  %2162 = vpow2.f32 %v672_v50  ;;  %v398_v45 = vmax.f32 %v4042_v44, 0.0 }
 0x188   : > { %v2151_v3 = vpop.eup %2150  ;;  %1687 = vst [vmem:[%s2784_s17 + $0x1c8] sm:$0xff] %v1619_v20  ;;  %v1208_v52 = vsel %vm4237_vm10, %v1205_v55, %v1202_v54  ;;  %v674_v38 = vmul.f32 1.442695, %v540_v19  ;;  %v541_v33 = vsub.f32 0.0, %v473_v27  ;;  %v1223_v25 = vmul.f32 %v4169_v35, %v1222_v29  ;;  %v1488_v55 = vld [vmem:[%s2595_s22 + $0x1f0] sm:$0xff] }
 0x189   : > { %v4254_v11 = vpop.eup %2152  ;;  %v1348_v0 = vadd.f32 %v1208_v52, %v396_v34  ;;  %v1211_v6 = vmul.f32 0.6931472, %v2151_v3  ;;  %vm4258_vm12 = vcmp.lt.f32.partialorder %v1224_v30, 0.0004427343  ;;  %v1231_v39 = vadd.f32 1.0, %v1230_v32  ;;  %v1421_v32 = vld [vmem:[%s2555_s9 + $0x1f8] sm:$0xff] }
 0x18a   : > { %v1245_v40 = vadd.f32 1.0, %v4254_v11  ;;  %v2155_v62 = vpop.eup %2154  ;;  %2164 = vpow2.f32 %v674_v38  ;;  %v676_v44 = vmul.f32 1.442695, %v541_v33  ;;  %v1554_v15 = vsub.f32 %v1418_v63, %v1486_v53 }
 0x18b   : > { %v1620_v34 = vmul.f32 %v1552_v7, %v1348_v0  ;;  %v1217_v1 = vsel %vm4244_vm11, %v1214_v16, %v1211_v6  ;;  %v1220_v24 = vmul.f32 0.6931472, %v2155_v62  ;;  %v1233_v4 = vand.u32 2147483647, %v4212_v47 }
 0x18c   : > { %v1349_v35 = vadd.f32 %v1217_v1, %v397_v36  ;;  %2166 = vlog2.f32 %v1245_v40  ;;  %v1240_v8 = vadd.f32 1.0, %v1239_v61  ;;  %v1242_v36 = vand.u32 2147483647, %v4218_v58  ;;  %v1489_v61 = vld [vmem:[%s2595_s22 + $0x1f8] sm:$0xff]  ;;  %v1422_v1 = vld [vmem:[%s2555_s9 + $0x200] sm:$0xff] }
 0x18d   : > { %1688 = vst [vmem:[%s2784_s17 + $0x1d0] sm:$0xff] %v1620_v34  ;;  %2168 = vpow2.f32 %v676_v44  ;;  %v4272_v12 = vpop.eup %2156  ;;  %v1226_v7 = vsel %vm4258_vm12, %v1223_v25, %v1220_v24  ;;  %v399_v51 = vmax.f32 %v4077_v48, 0.0  ;;  %v1232_v22 = vmul.f32 %v4212_v47, %v1231_v39 }
 0x18e   : > { %v1621_v59 = vmul.f32 %v1553_v23, %v1349_v35  ;;  %v1350_v26 = vadd.f32 %v1226_v7, %v398_v45  ;;  %v1254_v41 = vadd.f32 1.0, %v4272_v12  ;;  %v1248_v46 = vmul.f32 -0.5, %v4254_v11 }
 0x18f   : > { %vm4284_vm13 = vcmp.lt.f32.partialorder %v1233_v4, 0.0004427343  ;;  %v1241_v2 = vmul.f32 %v4218_v58, %v1240_v8  ;;  %v400_v28 = vmax.f32 %v4090_v43, 0.0  ;;  %vm1243_vm14 = vcmp.lt.f32.partialorder %v1242_v36, 0.0004427343 }
 0x190   : > { %1689 = vst [vmem:[%s2784_s17 + $0x1d8] sm:$0xff] %v1621_v59  ;;  %v1622_v17 = vmul.f32 %v1554_v15, %v1350_v26  ;;  %2170 = vlog2.f32 %v1254_v41  ;;  %v1555_v47 = vsub.f32 %v1419_v9, %v1487_v42  ;;  %v1556_v30 = vsub.f32 %v1420_v37, %v1488_v55  ;;  %v1424_v55 = vld [vmem:[%s2555_s9 + $0x210] sm:$0xff] }
 0x191   : > { %v2159_v56 = vpop.eup %2158  ;;  %v1249_v20 = vadd.f32 1.0, %v1248_v46  ;;  %v1251_v50 = vand.u32 2147483647, %v4254_v11  ;;  %v1257_v16 = vmul.f32 -0.5, %v4272_v12  ;;  %v401_v6 = vmax.f32 %v4118_v57, 0.0  ;;  %v1490_v57 = vld [vmem:[%s2595_s22 + $0x200] sm:$0xff] }
 0x192   : > { %v2161_v23 = vpop.eup %2160  ;;  %v1229_v48 = vmul.f32 0.6931472, %v2159_v56  ;;  %1690 = vst [vmem:[%s2784_s17 + $0x1e0] sm:$0xff] %v1622_v17  ;;  %v1260_v5 = vand.u32 2147483647, %v4272_v12  ;;  %v1557_v63 = vsub.f32 %v1421_v32, %v1489_v61  ;;  %v402_v35 = vmax.f32 %v4145_v49, 0.0 }
 0x193   : > { %v1238_v14 = vmul.f32 0.6931472, %v2161_v23  ;;  %v1250_v52 = vmul.f32 %v4254_v11, %v1249_v20  ;;  %vm1252_vm15 = vcmp.lt.f32.partialorder %v1251_v50, 0.0004427343  ;;  %v1258_v38 = vadd.f32 1.0, %v1257_v16  ;;  %v1491_v49 = vld [vmem:[%s2595_s22 + $0x208] sm:$0xff] }
 0x194   : > { %v1235_v60 = vsel %vm4284_vm13, %v1232_v22, %v1229_v48  ;;  %v2163_v58 = vpop.eup %2162  ;;  %vm1261_vm0 = vcmp.lt.f32.partialorder %v1260_v5, 0.0004427343  ;;  %v1558_v4 = vsub.f32 %v1422_v1, %v1490_v57  ;;  %v1423_v22 = vld [vmem:[%s2555_s9 + $0x208] sm:$0xff]  ;;  %v403_v46 = vmax.f32 %v4186_v31, 0.0  ;;  %v1492_v23 = vld [vmem:[%s2595_s22 + $0x210] sm:$0xff]  ;;  %v1493_v20 = vld [vmem:[%s2595_s22 + $0x218] sm:$0xff] }
 0x195   : > { %v1351_v54 = vadd.f32 %v1235_v60, %v399_v51  ;;  %v1244_v29 = vsel %vm1243_vm14, %v1241_v2, %v1238_v14  ;;  %v1263_v18 = vadd.f32 1.0, %v2163_v58  ;;  %v1266_v40 = vmul.f32 -0.5, %v2163_v58 }
 0x196   : > { %v1352_v43 = vadd.f32 %v1244_v29, %v400_v28  ;;  %v1259_v34 = vmul.f32 %v4272_v12, %v1258_v38  ;;  %v1269_v7 = vand.u32 2147483647, %v2163_v58  ;;  %v1559_v2 = vsub.f32 %v1423_v22, %v1491_v49 }
 0x197   : > { %v1623_v19 = vmul.f32 %v1555_v47, %v1351_v54  ;;  %v2165_v27 = vpop.eup %2164  ;;  %2172 = vlog2.f32 %v1263_v18  ;;  %v1267_v8 = vadd.f32 1.0, %v1266_v40  ;;  %v404_v47 = vmax.f32 %v4198_v10, 0.0 }
 0x198   : > { %v1624_v3 = vmul.f32 %v1556_v30, %v1352_v43  ;;  %v1272_v33 = vadd.f32 1.0, %v2165_v27  ;;  %v1275_v15 = vmul.f32 -0.5, %v2165_v27  ;;  %v1278_v9 = vand.u32 2147483647, %v2165_v27  ;;  %v1425_v30 = vld [vmem:[%s2555_s9 + $0x218] sm:$0xff] }
 0x199   : > { %v2167_v0 = vpop.eup %2166  ;;  %1691 = vst [vmem:[%s2784_s17 + $0x1e8] sm:$0xff] %v1623_v19  ;;  %v1268_v51 = vmul.f32 %v2163_v58, %v1267_v8  ;;  %vm1270_vm1 = vcmp.lt.f32.partialorder %v1269_v7, 0.0004427343  ;;  %v1560_v54 = vsub.f32 %v1424_v55, %v1492_v23  ;;  %v405_v29 = vmax.f32 %v4232_v13, 0.0 }
 0x19a   : > { %v2169_v45 = vpop.eup %2168  ;;  %1692 = vst [vmem:[%s2784_s17 + $0x1f0] sm:$0xff] %v1624_v3  ;;  %v1247_v25 = vmul.f32 0.6931472, %v2167_v0  ;;  %2174 = vlog2.f32 %v1272_v33  ;;  %v1276_v26 = vadd.f32 1.0, %v1275_v15  ;;  %vm1279_vm2 = vcmp.lt.f32.partialorder %v1278_v9, 0.0004427343 }
 0x19b   : > { %v1281_v11 = vadd.f32 1.0, %v2169_v45  ;;  %v1284_v36 = vmul.f32 -0.5, %v2169_v45  ;;  %v1287_v21 = vand.u32 2147483647, %v2169_v45  ;;  %v1561_v18 = vsub.f32 %v1425_v30, %v1493_v20 }
 0x19c   : > { %v1253_v53 = vsel %vm1252_vm15, %v1250_v52, %v1247_v25  ;;  %v1277_v37 = vmul.f32 %v2165_v27, %v1276_v26 }
 0x19d   : > { %v1353_v62 = vadd.f32 %v1253_v53, %v401_v6  ;;  %2176 = vlog2.f32 %v1281_v11  ;;  %v2171_v44 = vpop.eup %2170  ;;  %v1285_v56 = vadd.f32 1.0, %v1284_v36  ;;  %vm1288_vm3 = vcmp.lt.f32.partialorder %v1287_v21, 0.0004427343 }
 0x19e   : > { %v1256_v39 = vmul.f32 0.6931472, %v2171_v44 }
 0x19f   : > { %v1625_v24 = vmul.f32 %v1557_v63, %v1353_v62  ;;  %v1286_v60 = vmul.f32 %v2169_v45, %v1285_v56 }
 0x1a0   : > { %v1262_v59 = vsel %vm1261_vm0, %v1259_v34, %v1256_v39 }
 0x1a1   : > { %1693 = vst [vmem:[%s2784_s17 + $0x1f8] sm:$0xff] %v1625_v24  ;;  %v1354_v12 = vadd.f32 %v1262_v59, %v402_v35 }
 0x1a3   : > { %v1626_v41 = vmul.f32 %v1558_v4, %v1354_v12 }
 0x1a4   : > { %v2173_v42 = vpop.eup %2172 }
 0x1a5   : > { %1694 = vst [vmem:[%s2784_s17 + $0x200] sm:$0xff] %v1626_v41  ;;  %v1265_v17 = vmul.f32 0.6931472, %v2173_v42 }
 0x1a7   : > { %v2175_v48 = vpop.eup %2174  ;;  %v1271_v28 = vsel %vm1270_vm1, %v1268_v51, %v1265_v17 }
 0x1a8   : > { %v1355_v14 = vadd.f32 %v1271_v28, %v403_v46  ;;  %v1274_v31 = vmul.f32 0.6931472, %v2175_v48 }
 0x1aa   : > { %v2177_v58 = vpop.eup %2176  ;;  %v1627_v50 = vmul.f32 %v1559_v2, %v1355_v14  ;;  %v1280_v16 = vsel %vm1279_vm2, %v1277_v37, %v1274_v31 }
 0x1ab   : > { %v1283_v43 = vmul.f32 0.6931472, %v2177_v58  ;;  %v1356_v10 = vadd.f32 %v1280_v16, %v404_v47 }
 0x1ac   : > { %1695 = vst [vmem:[%s2784_s17 + $0x208] sm:$0xff] %v1627_v50 }
 0x1ad   : > { %v1289_v19 = vsel %vm1288_vm3, %v1286_v60, %v1283_v43  ;;  %v1628_v27 = vmul.f32 %v1560_v54, %v1356_v10 }
 0x1ae   : > { %v1357_v3 = vadd.f32 %v1289_v19, %v405_v29 }
 0x1af   : > { %1696 = vst [vmem:[%s2784_s17 + $0x210] sm:$0xff] %v1628_v27 }
 0x1b0   : > { %v1629_v13 = vmul.f32 %v1561_v18, %v1357_v3 }
 0x1b2   : > { %1697 = vst [vmem:[%s2784_s17 + $0x218] sm:$0xff] %v1629_v13 }
 0x1b3   : > { %2275 = shalt.err (!%p2272_p6)
}
 0x1b4   : > { %s2276_s7 = scalar_lea.hbm %s4325_s30, 8704  ;;  %s2280_s10 = scalar_lea.hbm %s4375_s3, 17408 }
 0x1b5   : > { %p2277_p12 = scmp.ne.s32.totalorder %s4325_s30, %s2276_s7  ;;  %p2281_p4 = scmp.lt.s32.totalorder %s4325_s30, %s4375_s3 }
 0x1b6   : > { %p2282_p2 = scmp.lt.s32.totalorder %s2280_s10, %s2276_s7 }
 0x1b7   : > { %p2278_p0 = pnand %p2277_p12, %p4573_p7 }
 0x1b8   : > { %p2283_p5 = por %p2282_p2, %p2281_p4 }
 0x1b9   : > { %p2279_p11 = pneg %p2278_p0 }
 0x1bb   : > { %p2284_p13 = pnand %p2283_p5, %p2279_p11 }
 0x1bd   : > { %2287 = shalt.err (!%p2284_p13)
}
 0x1be   : > { %s2338_s29 = smov 128   ;;  %s2339_s9 = smov 8  }
 0x1bf   : > { %1852 = dma.vmem_to_hbm [thread:$0]  (%p4573_p7), %s4327_s25, 8704, %s4325_s30, %s1699_s16, %s2338_s29, %s2338_s29, %s2339_s9  }
 0x1c0 PF: > { %s1727_s22 = sand.u32 1, %s2318_s12   ;;  %p4574_p8 = scmp.ne.s32.totalorder %s4395_s24, 0 }
 0x1c1   : > { %p4575_p10 = scmp.ge.s32.totalorder %s2330_s15, 2  ;;  %s1728_s17 = scalar_lea.sflag [#allocation4], %s1727_s22 }
 0x1c3   : > { %p1865_p1 = pnand %p4575_p10, %p4574_p8 }
 0x1c5   : > { %p1866_p3 = pneg %p1865_p1 }
 0x1c7   : > { %2313 = dma.done.wait (%p1866_p3), %s1728_s17, 8704  }
 0x1c8   : > { %2315 = vsyncadd (%p1866_p3), %s1728_s17, 4294958592  ;;  %p19_p9 = scmp.ge.s32.totalorder %s2385_s18, 4   ;;  %s4576_s12 = smov %s2322_s13 }
 0x1c9   : > { %s4577_s13 = smov %s2326_s14  ;;  %s4578_s14 = smov %s2397_s21 }
 0x1ca   : > { %s4579_s15 = smov %s2385_s18  ;;  %21 = sbr.rel (!%p19_p9) target bundleno = 10 (0xa), region = 101 }
 0x1cf   :  { %1733 = vsyncpa [#allocation3], 1 }
 0x1d0   :  { %1735 = vsyncpa [#allocation3 + $0x1], 1 }
 0x1d1   :  { %1736 = vsyncpa [#allocation6], 1 }
 0x1d2   :  { %1738 = vsyncpa [#allocation6 + $0x1], 1 }
 0x1d3   :  { %1739 = vsyncpa [#allocation4], 1 }
 0x1d4   :  { %1741 = vsyncpa [#allocation4 + $0x1], 1 }

</bundles_post_ra>
